<compile_context>
chip_gen: v7x
topology: tpu7x:2x2x1
jax: 0.10.0
libtpu: 0.0.40
codegen_flags: <defaults>
</compile_context>

<pallas_src>
import functools
import math

import jax
import jax.numpy as jnp
from jax.experimental import pallas as pl
from jax.experimental.pallas import tpu as pltpu


def _round_up(x, m):
    return ((x + m - 1) // m) * m


# ----------------------------------------------------------------------------
# batched_index_select: exact JAX equivalent of the PyTorch helper
# ----------------------------------------------------------------------------
def batched_index_select(source, dim, index):
    # source: [B, ...], index: [B, K]  (per-batch indices along `dim`)
    view = [source.shape[0]] + [1 if i != dim else -1 for i in range(1, source.ndim)]
    idx = index.reshape(view)
    expanse = [source.shape[i] if i != dim else index.shape[-1]
               for i in range(source.ndim)]
    idx = jnp.broadcast_to(idx, tuple(expanse))
    return jnp.take_along_axis(source, idx, axis=dim)


# ----------------------------------------------------------------------------
# Fused Pallas kernel: tokenize (conv1x1+ReLU+conv1x1) -> cross attention ->
# softmax -> soft-argmax depth.  One grid step handles `tile_br` (batch,row)
# pairs; everything intermediate stays in VMEM/vregs.
# ----------------------------------------------------------------------------
def _tokenize_attend_depth_kernel(x1_ref, x2_ref, w1_ref, b1_ref, w2_ref,
                                  b2_ref, bins_ref, kmask_ref,
                                  attn_ref, depth_ref,
                                  *, tile_br, k, kp, scale):
    w1 = w1_ref[...]                       # (Cp, Fp)   bf16/f32
    w2 = w2_ref[...]                       # (Fp, Dp)
    b1 = b1_ref[...]                       # (1, Fp)    f32
    b2 = b2_ref[...]                       # (1, Dp)    f32
    dp = w2.shape[1]

    def tokenize(x2d):
        # x2d: (n, Cp) -> tokens (n, Dp), f32 accumulation on the MXU.
        feat = jnp.dot(x2d, w1, preferred_element_type=jnp.float32) + b1
        feat = jnp.maximum(feat, 0.0)
        tok = jnp.dot(feat.astype(w2.dtype), w2,
                      preferred_element_type=jnp.float32) + b2
        return tok

    # Queries: target tokens (only the K valid sampled cols).
    t1 = tokenize(x1_ref[...]).reshape(tile_br, k, dp)          # (tb, K,  Dp)
    # Keys: context tokens, key axis pre-padded to Kp (lane-dense downstream).
    t2 = tokenize(x2_ref[...]).reshape(tile_br, kp, dp)         # (tb, Kp, Dp)

    # Cross attention scores, contraction over D (bf16 MXU, f32 accum).
    s = jnp.einsum('bqd,bkd->bqk',
                   t1.astype(w1.dtype), t2.astype(w1.dtype),
                   preferred_element_type=jnp.float32) * scale  # (tb, K, Kp)
    # Mask padded key columns (additive -1e30) so they get ~0 attention.
    s = s + kmask_ref[...]                                      # (1, 1, Kp)

    m = jnp.max(s, axis=-1, keepdims=True)
    e = jnp.exp(s - m)
    denom = jnp.sum(e, axis=-1, keepdims=True)
    attn = e * pl.reciprocal(denom, approx=True)                # EUP divide

    # Lane-dense 2-D slab store: (tile_br*K, Kp) with Kp a multiple of 128.
    attn2d = attn.reshape(tile_br * k, kp)
    attn_ref[...] = attn2d.astype(attn_ref.dtype)

    # Depth regression as a batched matvec on the MXU (bins zero-padded
    # beyond K, so padded keys contribute nothing).
    depth = jnp.dot(attn2d, bins_ref[...],
                    preferred_element_type=jnp.float32)         # (tile_br*K, 1)
    depth_ref[...] = depth.astype(depth_ref.dtype)


def tokenize_attention_depth(x1, x2, w1, b1, w2, b2, bins, *, tile_br=4,
                             compute_dtype=jnp.bfloat16,
                             attn_dtype=jnp.float32):
    """x1, x2: [BR, K, C] gathered target/context pixels -> (attn, depth).

    attn: [BR, K, K] (attn_dtype), depth: [BR, K] (f32).
    """
    br, k, c = x1.shape
    f_dim = w1.shape[1]
    d_dim = w2.shape[1]

    # Lane-dense matmul dims: pad cin / feat / token dims and the key axis to
    # multiples of 128.  These pads touch only the small gathered pixel arrays
    # and the weights — never a full image (review: avoid full-array jnp.pad).
    cp = _round_up(c, 128)
    fp = _round_up(f_dim, 128)
    dp = _round_up(d_dim, 128)
    kp = _round_up(k, 128)
    scale = 1.0 / math.sqrt(d_dim)          # true token dim (pads contribute 0)

    # tile_br sized so the key-side tokenization intermediate
    # (tile_br*Kp, Fp) f32 stays near the vreg budget; each grid step still
    # moves >100 KB and does ~10s of MFLOPs, amortizing per-step overhead.
    br_pad = _round_up(br, tile_br)
    n_steps = br_pad // tile_br             # demo: 4 steps (even -> v7x 2 TCs)

    x1p = jnp.pad(x1, ((0, br_pad - br), (0, 0), (0, cp - c))).astype(compute_dtype)
    x2p = jnp.pad(x2, ((0, br_pad - br), (0, kp - k), (0, cp - c))).astype(compute_dtype)
    w1p = jnp.pad(w1, ((0, cp - c), (0, fp - f_dim))).astype(compute_dtype)
    w2p = jnp.pad(w2, ((0, fp - f_dim), (0, dp - d_dim))).astype(compute_dtype)
    b1p = jnp.pad(b1, (0, fp - f_dim)).reshape(1, fp).astype(jnp.float32)
    b2p = jnp.pad(b2, (0, dp - d_dim)).reshape(1, dp).astype(jnp.float32)
    bins_col = jnp.pad(bins.astype(jnp.float32), (0, kp - k)).reshape(kp, 1)
    kmask = jnp.where(jnp.arange(kp) < k, 0.0, -1e30).astype(jnp.float32)
    kmask = kmask.reshape(1, 1, kp)

    # Flatten the pixel inputs to 2-D slabs (channels on the lane axis).
    x1_2d = x1p.reshape(br_pad * k, cp)
    x2_2d = x2p.reshape(br_pad * kp, cp)

    # NOTE: w1p/w2p blocks are constant across the grid (<=128 KB each at
    # these dims); on v7x with much larger feat/token dims, single-buffer
    # them (pipeline_mode=pl.Buffered(1)) before shrinking tile_br.
    attn2d, depth2d = pl.pallas_call(
        functools.partial(_tokenize_attend_depth_kernel,
                          tile_br=tile_br, k=k, kp=kp, scale=scale),
        out_shape=(jax.ShapeDtypeStruct((br_pad * k, kp), attn_dtype),
                   jax.ShapeDtypeStruct((br_pad * k, 1), jnp.float32)),
        grid=(n_steps,),
        in_specs=[
            pl.BlockSpec((tile_br * k, cp), lambda i: (i, 0)),    # target pixels
            pl.BlockSpec((tile_br * kp, cp), lambda i: (i, 0)),   # context pixels
            pl.BlockSpec((cp, fp), lambda i: (0, 0)),             # backbone W
            pl.BlockSpec((1, fp), lambda i: (0, 0)),              # backbone b
            pl.BlockSpec((fp, dp), lambda i: (0, 0)),             # tokenizer W
            pl.BlockSpec((1, dp), lambda i: (0, 0)),              # tokenizer b
            pl.BlockSpec((kp, 1), lambda i: (0, 0)),              # depth bins
            pl.BlockSpec((1, 1, kp), lambda i: (0, 0, 0)),        # key mask
        ],
        out_specs=[
            pl.BlockSpec((tile_br * k, kp), lambda i: (i, 0)),    # attn slab
            pl.BlockSpec((tile_br * k, 1), lambda i: (i, 0)),     # depth
        ],
        compiler_params=pltpu.CompilerParams(
            dimension_semantics=("parallel",),
            vmem_limit_bytes=32 * 1024 * 1024),
    )(x1_2d, x2_2d, w1p, b1p, w2p, b2p, bins_col, kmask)

    attn = attn2d.reshape(br_pad, k, kp)[:br, :, :k]
    depth = depth2d.reshape(br_pad, k)[:br]
    return attn, depth


# ----------------------------------------------------------------------------
# Parameter init (deterministic, mirrors _reset_parameters: kaiming fan_out
# relu for Conv2d weights, zero bias).
# ----------------------------------------------------------------------------
def init_params(key, cin, feat_dim, token_dim):
    k1, k2 = jax.random.split(key)
    std_b = math.sqrt(2.0 / feat_dim)            # fan_out = Cout * 1 * 1
    std_t = math.sqrt(2.0 / token_dim)
    return {
        "backbone_w": jax.random.normal(k1, (cin, feat_dim), jnp.float32) * std_b,
        "backbone_b": jnp.zeros((feat_dim,), jnp.float32),
        "tokenizer_w": jax.random.normal(k2, (feat_dim, token_dim), jnp.float32) * std_t,
        "tokenizer_b": jnp.zeros((token_dim,), jnp.float32),
    }


# ----------------------------------------------------------------------------
# Full forward (mirrors TransformerNet.forward structure)
# ----------------------------------------------------------------------------
def transformer_net_forward(params, target, context, sampled_rows, sampled_cols,
                            *, min_depth, max_depth, num_bins,
                            compute_dtype=jnp.bfloat16,
                            attn_dtype=jnp.float32):
    bs, c, h, w = target.shape

    # ---- gather sampled pixels FIRST (backbone stand-in is pointwise, so
    # gather-then-tokenize == tokenize-then-gather).  Only B*R*K*C elements
    # move; no full-image concat/transpose, no token-level gather.
    # TODO(synk): real Backbone is a multi-scale ResNet encoder needing pixel
    #             neighborhoods; with it, the gather would move into the
    #             kernel via a PrefetchScalarGridSpec-driven DMA instead.
    def gather_pixels(x_nchw):
        g = x_nchw
        if sampled_cols is not None:
            g = batched_index_select(g, 3, sampled_cols)      # [B, C, H, K]
        if sampled_rows is not None:
            g = batched_index_select(g, 2, sampled_rows)      # [B, C, R, K]
        return g.transpose(0, 2, 3, 1)                        # [B, R, K, C] (tiny)

    x1 = gather_pixels(target)                                # queries source
    x2 = gather_pixels(context)                               # keys source
    b_, r, k, _ = x1.shape
    br = b_ * r

    # ---- fused tokenize + cross attention + soft-argmax depth (one kernel) --
    # TODO(synk): cam-based epipolar triangulation path (cam != None) and the
    #             RegressionHead's full-resolution upsampling are omitted.
    assert num_bins == k, (
        "stand-in regression head requires num_bins == number of sampled cols")
    bins = jnp.linspace(min_depth, max_depth, num_bins, dtype=jnp.float32)
    attn, depth = tokenize_attention_depth(
        x1.reshape(br, k, c), x2.reshape(br, k, c),
        params["backbone_w"], params["backbone_b"],
        params["tokenizer_w"], params["tokenizer_b"],
        bins, compute_dtype=compute_dtype, attn_dtype=attn_dtype)

    attn_weight = attn.reshape(bs, r, k, k)
    depth = depth.reshape(bs, 1, r, k)
    return {"attn_weight": attn_weight, "depth": depth}


# ----------------------------------------------------------------------------
if __name__ == "__main__":
    key = jax.random.PRNGKey(0)
    k_t, k_c, k_r, k_cidx, k_p = jax.random.split(key, 5)

    B, C, H, W = 2, 4, 16, 16
    FEAT, TOKEN = 128, 128            # 128-aligned hidden dims (perf review)
    R, K = 8, 8                       # sampled rows / cols
    MIN_D, MAX_D, NUM_BINS = 0.5, 10.0, K

    target = jax.random.normal(k_t, (B, C, H, W), jnp.float32)
    context = jax.random.normal(k_c, (B, C, H, W), jnp.float32)
    sampled_rows = jax.random.randint(k_r, (B, R), 0, H, dtype=jnp.int32)
    sampled_cols = jax.random.randint(k_cidx, (B, K), 0, W, dtype=jnp.int32)

    params = init_params(k_p, C, FEAT, TOKEN)

    out = transformer_net_forward(params, target, context,
                                  sampled_rows, sampled_cols,
                                  min_depth=MIN_D, max_depth=MAX_D,
                                  num_bins=NUM_BINS)
    out = jax.block_until_ready(out)

    assert out["attn_weight"].shape == (B, R, K, K)
    assert out["depth"].shape == (B, 1, R, K)
    assert bool(jnp.all(jnp.isfinite(out["attn_weight"])))
    assert bool(jnp.all(jnp.isfinite(out["depth"])))
    # softmax rows should sum to ~1 (approx-reciprocal tolerance)
    row_sums = jnp.sum(out["attn_weight"], axis=-1)
    assert bool(jnp.all(jnp.abs(row_sums - 1.0) < 5e-2))
    print("KERNEL_OK")
</pallas_src>

<mosaic_0001>
module attributes {stable_mosaic.version = 11 : i64} {
  func.func @_tokenize_attend_depth_kernel(%arg0: i32, %arg1: memref<32x128xbf16, #tpu.memory_space<vmem>>, %arg2: memref<512x128xbf16, #tpu.memory_space<vmem>>, %arg3: memref<128x128xbf16, #tpu.memory_space<vmem>>, %arg4: memref<1x128xf32, #tpu.memory_space<vmem>>, %arg5: memref<128x128xbf16, #tpu.memory_space<vmem>>, %arg6: memref<1x128xf32, #tpu.memory_space<vmem>>, %arg7: memref<128x1xf32, #tpu.memory_space<vmem>>, %arg8: memref<1x1x128xf32, #tpu.memory_space<vmem>>, %arg9: memref<32x128xf32, #tpu.memory_space<vmem>>, %arg10: memref<32x1xf32, #tpu.memory_space<vmem>>) attributes {dimension_semantics = [#tpu.dimension_semantics<parallel>], iteration_bounds = array<i64: 4>, scalar_prefetch = 0 : i64, scratch_operands = 0 : i64, tpu.core_type = #tpu.core_type<tc>, window_params = [{transform_indices = @transform_0, window_bounds = array<i64: 32, 128>}, {transform_indices = @transform_1, window_bounds = array<i64: 512, 128>}, {pipeline_mode = #tpu.pipeline_mode<synchronous>, transform_indices = @transform_2, window_bounds = array<i64: 128, 128>}, {pipeline_mode = #tpu.pipeline_mode<synchronous>, transform_indices = @transform_3, window_bounds = array<i64: 1, 128>}, {pipeline_mode = #tpu.pipeline_mode<synchronous>, transform_indices = @transform_4, window_bounds = array<i64: 128, 128>}, {pipeline_mode = #tpu.pipeline_mode<synchronous>, transform_indices = @transform_5, window_bounds = array<i64: 1, 128>}, {pipeline_mode = #tpu.pipeline_mode<synchronous>, transform_indices = @transform_6, window_bounds = array<i64: 128, 1>}, {pipeline_mode = #tpu.pipeline_mode<synchronous>, transform_indices = @transform_7, window_bounds = array<i64: 1, 1, 128>}, {transform_indices = @transform_8, window_bounds = array<i64: 32, 128>}, {transform_indices = @transform_9, window_bounds = array<i64: 32, 1>}]} {
    %c0 = arith.constant 0 : index
    %c0_0 = arith.constant 0 : index
    %0 = vector.load %arg3[%c0, %c0_0] : memref<128x128xbf16, #tpu.memory_space<vmem>>, vector<128x128xbf16>
    %c0_1 = arith.constant 0 : index
    %c0_2 = arith.constant 0 : index
    %1 = vector.load %arg5[%c0_1, %c0_2] : memref<128x128xbf16, #tpu.memory_space<vmem>>, vector<128x128xbf16>
    %c0_3 = arith.constant 0 : index
    %c0_4 = arith.constant 0 : index
    %2 = vector.load %arg4[%c0_3, %c0_4] : memref<1x128xf32, #tpu.memory_space<vmem>>, vector<1x128xf32>
    %c0_5 = arith.constant 0 : index
    %c0_6 = arith.constant 0 : index
    %3 = vector.load %arg6[%c0_5, %c0_6] : memref<1x128xf32, #tpu.memory_space<vmem>>, vector<1x128xf32>
    %c0_7 = arith.constant 0 : index
    %c0_8 = arith.constant 0 : index
    %4 = vector.load %arg1[%c0_7, %c0_8] : memref<32x128xbf16, #tpu.memory_space<vmem>>, vector<32x128xbf16>
    %cst = arith.constant dense<0.000000e+00> : vector<32x128xf32>
    %5 = tpu.matmul %4, %0, %cst {dimension_numbers = #tpu.dot_dimension_numbers<[1], [0], [0], [1], [0, 0, 1, 1], [], []>} : vector<32x128xbf16>, vector<128x128xbf16>, vector<32x128xf32> -> vector<32x128xf32>
    %6 = vector.broadcast %2 : vector<1x128xf32> to vector<32x128xf32>
    %7 = arith.addf %5, %6 : vector<32x128xf32>
    %cst_9 = arith.constant 0.000000e+00 : f32
    %8 = vector.broadcast %cst_9 : f32 to vector<32x128xf32>
    %9 = arith.maximumf %7, %8 : vector<32x128xf32>
    %10 = arith.truncf %9 : vector<32x128xf32> to vector<32x128xbf16>
    %cst_10 = arith.constant dense<0.000000e+00> : vector<32x128xf32>
    %11 = tpu.matmul %10, %1, %cst_10 {dimension_numbers = #tpu.dot_dimension_numbers<[1], [0], [0], [1], [0, 0, 1, 1], [], []>} : vector<32x128xbf16>, vector<128x128xbf16>, vector<32x128xf32> -> vector<32x128xf32>
    %12 = vector.broadcast %3 : vector<1x128xf32> to vector<32x128xf32>
    %13 = arith.addf %11, %12 : vector<32x128xf32>
    %14 = vector.shape_cast %13 : vector<32x128xf32> to vector<4x8x128xf32>
    %c0_11 = arith.constant 0 : index
    %c0_12 = arith.constant 0 : index
    %15 = vector.load %arg2[%c0_11, %c0_12] : memref<512x128xbf16, #tpu.memory_space<vmem>>, vector<512x128xbf16>
    %cst_13 = arith.constant dense<0.000000e+00> : vector<512x128xf32>
    %16 = tpu.matmul %15, %0, %cst_13 {dimension_numbers = #tpu.dot_dimension_numbers<[1], [0], [0], [1], [0, 0, 1, 1], [], []>} : vector<512x128xbf16>, vector<128x128xbf16>, vector<512x128xf32> -> vector<512x128xf32>
    %17 = vector.broadcast %2 : vector<1x128xf32> to vector<512x128xf32>
    %18 = arith.addf %16, %17 : vector<512x128xf32>
    %cst_14 = arith.constant 0.000000e+00 : f32
    %19 = vector.broadcast %cst_14 : f32 to vector<512x128xf32>
    %20 = arith.maximumf %18, %19 : vector<512x128xf32>
    %21 = arith.truncf %20 : vector<512x128xf32> to vector<512x128xbf16>
    %cst_15 = arith.constant dense<0.000000e+00> : vector<512x128xf32>
    %22 = tpu.matmul %21, %1, %cst_15 {dimension_numbers = #tpu.dot_dimension_numbers<[1], [0], [0], [1], [0, 0, 1, 1], [], []>} : vector<512x128xbf16>, vector<128x128xbf16>, vector<512x128xf32> -> vector<512x128xf32>
    %23 = vector.broadcast %3 : vector<1x128xf32> to vector<512x128xf32>
    %24 = arith.addf %22, %23 : vector<512x128xf32>
    %25 = vector.shape_cast %24 : vector<512x128xf32> to vector<4x128x128xf32>
    %26 = arith.truncf %14 : vector<4x8x128xf32> to vector<4x8x128xbf16>
    %27 = arith.truncf %25 : vector<4x128x128xf32> to vector<4x128x128xbf16>
    "tpu.trace_start"() <{level = 10 : i32, message = "bqd,bkd->bqk"}> : () -> ()
    %cst_16 = arith.constant dense<0.000000e+00> : vector<4x8x128xf32>
    %28 = tpu.matmul %26, %27, %cst_16 {dimension_numbers = #tpu.dot_dimension_numbers<[2], [2], [1], [1], [0, 0, 0, 1, 1, 1], [0], [0]>} : vector<4x8x128xbf16>, vector<4x128x128xbf16>, vector<4x8x128xf32> -> vector<4x8x128xf32>
    "tpu.trace_stop"() : () -> ()
    %cst_17 = arith.constant 0.0883883461 : f32
    %29 = vector.broadcast %cst_17 : f32 to vector<4x8x128xf32>
    %30 = arith.mulf %28, %29 : vector<4x8x128xf32>
    %c0_18 = arith.constant 0 : index
    %c0_19 = arith.constant 0 : index
    %c0_20 = arith.constant 0 : index
    %31 = vector.load %arg8[%c0_18, %c0_19, %c0_20] : memref<1x1x128xf32, #tpu.memory_space<vmem>>, vector<1x1x128xf32>
    %32 = vector.broadcast %31 : vector<1x1x128xf32> to vector<4x8x128xf32>
    %33 = arith.addf %30, %32 : vector<4x8x128xf32>
    %cst_21 = arith.constant dense<0xFF800000> : vector<4x8xf32>
    %34 = vector.multi_reduction <maximumf>, %33, %cst_21 [2] : vector<4x8x128xf32> to vector<4x8xf32>
    %35 = vector.shape_cast %34 : vector<4x8xf32> to vector<4x8x1xf32>
    %36 = vector.broadcast %35 : vector<4x8x1xf32> to vector<4x8x128xf32>
    %37 = arith.subf %33, %36 : vector<4x8x128xf32>
    %38 = math.exp %37 : vector<4x8x128xf32>
    %cst_22 = arith.constant dense<0.000000e+00> : vector<4x8xf32>
    %39 = vector.multi_reduction <add>, %38, %cst_22 [2] : vector<4x8x128xf32> to vector<4x8xf32>
    %40 = vector.shape_cast %39 : vector<4x8xf32> to vector<4x8x1xf32>
    %41 = tpu.reciprocal %40 {approx = true} : vector<4x8x1xf32> -> vector<4x8x1xf32>
    %42 = vector.broadcast %41 : vector<4x8x1xf32> to vector<4x8x128xf32>
    %43 = arith.mulf %38, %42 : vector<4x8x128xf32>
    %44 = vector.shape_cast %43 : vector<4x8x128xf32> to vector<32x128xf32>
    %c0_23 = arith.constant 0 : index
    %c0_24 = arith.constant 0 : index
    %45 = vector.load %arg9[%c0_23, %c0_24] : memref<32x128xf32, #tpu.memory_space<vmem>>, vector<32x128xf32>
    tpu.vector_store %arg9[%c0_23, %c0_24], %44 {strides = array<i32>} : memref<32x128xf32, #tpu.memory_space<vmem>>, vector<32x128xf32>,
    %c0_25 = arith.constant 0 : index
    %c0_26 = arith.constant 0 : index
    %46 = vector.load %arg7[%c0_25, %c0_26] : memref<128x1xf32, #tpu.memory_space<vmem>>, vector<128x1xf32>
    %cst_27 = arith.constant dense<0.000000e+00> : vector<32x1xf32>
    %47 = tpu.matmul %44, %46, %cst_27 {dimension_numbers = #tpu.dot_dimension_numbers<[1], [0], [0], [1], [0, 0, 1, 1], [], []>} : vector<32x128xf32>, vector<128x1xf32>, vector<32x1xf32> -> vector<32x1xf32>
    %c0_28 = arith.constant 0 : index
    %c0_29 = arith.constant 0 : index
    %48 = vector.load %arg10[%c0_28, %c0_29] : memref<32x1xf32, #tpu.memory_space<vmem>>, vector<32x1xf32>
    tpu.vector_store %arg10[%c0_28, %c0_29], %47 {strides = array<i32>} : memref<32x1xf32, #tpu.memory_space<vmem>>, vector<32x1xf32>,
    return
  }
  func.func @transform_0(%arg0: i32) -> (i32, i32) {
    %c0_i32 = arith.constant 0 : i32
    %c0_i32_0 = arith.constant 0 : i32
    return %arg0, %c0_i32 : i32, i32
  }
  func.func @transform_1(%arg0: i32) -> (i32, i32) {
    %c0_i32 = arith.constant 0 : i32
    %c0_i32_0 = arith.constant 0 : i32
    return %arg0, %c0_i32 : i32, i32
  }
  func.func @transform_2(%arg0: i32) -> (i32, i32) {
    %c0_i32 = arith.constant 0 : i32
    %c0_i32_0 = arith.constant 0 : i32
    %c0_i32_1 = arith.constant 0 : i32
    return %c0_i32, %c0_i32_0 : i32, i32
  }
  func.func @transform_3(%arg0: i32) -> (i32, i32) {
    %c0_i32 = arith.constant 0 : i32
    %c0_i32_0 = arith.constant 0 : i32
    %c0_i32_1 = arith.constant 0 : i32
    return %c0_i32, %c0_i32_0 : i32, i32
  }
  func.func @transform_4(%arg0: i32) -> (i32, i32) {
    %c0_i32 = arith.constant 0 : i32
    %c0_i32_0 = arith.constant 0 : i32
    %c0_i32_1 = arith.constant 0 : i32
    return %c0_i32, %c0_i32_0 : i32, i32
  }
  func.func @transform_5(%arg0: i32) -> (i32, i32) {
    %c0_i32 = arith.constant 0 : i32
    %c0_i32_0 = arith.constant 0 : i32
    %c0_i32_1 = arith.constant 0 : i32
    return %c0_i32, %c0_i32_0 : i32, i32
  }
  func.func @transform_6(%arg0: i32) -> (i32, i32) {
    %c0_i32 = arith.constant 0 : i32
    %c0_i32_0 = arith.constant 0 : i32
    %c0_i32_1 = arith.constant 0 : i32
    return %c0_i32, %c0_i32_0 : i32, i32
  }
  func.func @transform_7(%arg0: i32) -> (i32, i32, i32) {
    %c0_i32 = arith.constant 0 : i32
    %c0_i32_0 = arith.constant 0 : i32
    %c0_i32_1 = arith.constant 0 : i32
    %c0_i32_2 = arith.constant 0 : i32
    return %c0_i32, %c0_i32_0, %c0_i32_1 : i32, i32, i32
  }
  func.func @transform_8(%arg0: i32) -> (i32, i32) {
    %c0_i32 = arith.constant 0 : i32
    %c0_i32_0 = arith.constant 0 : i32
    return %arg0, %c0_i32 : i32, i32
  }
  func.func @transform_9(%arg0: i32) -> (i32, i32) {
    %c0_i32 = arith.constant 0 : i32
    %c0_i32_0 = arith.constant 0 : i32
    return %arg0, %c0_i32 : i32, i32
  }
}

</mosaic_0001>

<bundles_post_ra>
// kernel: tpu_custom_call.1
= control target key start
LH: loop header
LB: loop body
LE: loop exit
PB: predicated region body
PF: predicated region fallthrough
CT: control target
= control target key end

     0   :  { %15 = vsyncpa [#allocation3], 0  ;;  %s3605_s0 = inlined_call_operand.vmem [shape: bf16[128,128], index: 0, kind: input, shape index: {}]   ;;  %s3606_s1 = inlined_call_operand.hbm [shape: bf16[2048,128], index: 1, kind: input, shape index: {}]   ;;  %s3607_s2 = inlined_call_operand.vmem [shape: bf16[128,128], index: 2, kind: input, shape index: {}]   ;;  %s3608_s3 = inlined_call_operand.vmem [shape: f32[1,128], index: 3, kind: input, shape index: {}]   ;;  %s3609_s4 = inlined_call_operand.hbm [shape: bf16[128,128], index: 4, kind: input, shape index: {}]   ;;  %s3610_s5 = inlined_call_operand.vmem [shape: f32[1,128], index: 5, kind: input, shape index: {}]   ;;  %s3611_s6 = inlined_call_operand.vmem [shape: f32[128,1], index: 6, kind: input, shape index: {}]   ;;  %s3612_s7 = inlined_call_operand.vmem [shape: f32[1,1,128], index: 7, kind: input, shape index: {}]   ;;  %s3613_s8 = inlined_call_operand.hbm [shape: f32[128,128], index: 8, kind: output, shape index: {0}]   ;;  %s3614_s9 = inlined_call_operand.vmem [shape: f32[128,1], index: 9, kind: output, shape index: {1}]  }
   0x1   :  { %17 = vsyncpa [#allocation3 + $0x1], 0 }
   0x2   :  { %18 = vsyncpa [#allocation6], 0 }
   0x3   :  { %19 = vsyncpa [#allocation4], 0 }
   0x4   :  { %21 = vsyncpa [#allocation4 + $0x1], 0  ;;  %s3012_s30 = smov 0   ;;  %s3014_s10 = smov 0  }
   0x5   :  { %s3016_s11 = smov 0   ;;  %s3018_s12 = smov 0  }
   0x6 LB: > { %s3033_s13 = sadd.s32 4294967295, %s2951_s12   ;;  %s2097_s14 = sadd.s32 4294967294, %s2951_s12   ;;  %s2951_s12 = sphi %s3018_s12, %s3638_s12   ;;  %s2947_s11 = sphi %s3016_s11, %s3641_s11   ;;  %s2943_s10 = sphi %s3014_s10, %s3640_s10   ;;  %s2939_s30 = sphi %s3012_s30, %s3639_s30  }
   0x7   : > { %p73_p0 = scmp.ne.s32.totalorder %s2943_s10, %s2939_s30  ;;  %p3615_p1 = scmp.eq.s32.totalorder %s3033_s13, 0 }
   0x8   : > { %p229_p3 = scmp.eq.s32.totalorder %s2097_s14, 3  ;;  %p2098_p5 = scmp.ge.s32.totalorder %s2951_s12, 1 }
   0x9   : > { %p3042_p4 = por %p3615_p1, %p73_p0  ;;  %p262_p7 = scmp.lt.s32.totalorder %s2951_s12, 5 }
   0xa   : > { %p3047_p6 = por %p229_p3, %p73_p0  ;;  %s2953_s18 = smov [#allocation5]  }
   0xb   : > { %s3622_s15 = scalar_select %p3042_p4, 1, 0 }
   0xc   : > { %s3623_s16 = scalar_select %p3047_p6, 1, 0 }
   0xd   : > { %p3052_p8 = pnand %p2098_p5, %p262_p7  ;;  %s280_s19 = sshll.u32 %s2953_s18, 4  ;;  %s281_s19 = int_to_ptr.vmem [resolvable:$true] %s280_s19 }
   0xe   : > { %3624 = sst [smem:[#allocation11_spill]] %s3623_s16  ;;  %s3065_s21 = sadd.s32 1, %s2951_s12  }
   0xf   : > { %s3625_s17 = scalar_select %p3052_p8, 1, 0 }
  0x10   : > { %p2702_p9 = pneg %p3052_p8  ;;  %3627 = sst [smem:[#allocation12_spill]] %s3065_s21 }
  0x11   : > { %s60_s22 = sadd.s32 1, %s2947_s11  ;;  %s57_s23 = ssub.s32 %s2951_s12, %s3065_s21 }
  0x12   : > { %p3060_p10 = pnand %p2702_p9, %p3615_p1  ;;  %s2823_s26 = scalar_lea.hbm %s3609_s4, 1024 }
  0x13   : > { %p2824_p11 = scmp.ne.s32.totalorder %s3609_s4, %s2823_s26  ;;  %p2830_p3 = scmp.lt.u32.totalorder %s2823_s26, %s3609_s4 }
  0x14   : > { %p2825_p12 = pneg %p3060_p10 }
  0x16   : > { %p2826_p13 = pnand %p2825_p12, %p2824_p11 }
  0x18   : > { %p2827_p0 = pneg %p2826_p13 }
  0x1a   : > { %p2832_p5 = pnand %p2830_p3, %p2827_p0 }
  0x1c   : > { %2835 = shalt.err (!%p2832_p5)
}
  0x1d   : > { %s2836_s18 = scalar_lea.vmem %s281_s19, 1024  ;;  %p2844_p2 = scmp.lt.s32.totalorder %s281_s19, %s281_s19 }
  0x1e   : > { %p2837_p7 = scmp.ne.s32.totalorder %s281_s19, %s2836_s18  ;;  %p2845_p6 = scmp.lt.s32.totalorder %s2836_s18, %s2836_s18 }
  0x20   : > { %p2839_p9 = pnand %p2837_p7, %p2825_p12  ;;  %p2846_p4 = por %p2845_p6, %p2844_p2 }
  0x22   : > { %p2840_p1 = pneg %p2839_p9 }
  0x24   : > { %p2847_p8 = pnand %p2846_p4, %p2840_p1 }
  0x26   : > { %2850 = shalt.err (!%p2847_p8)
}
  0x27   : > { %s3621_s24 = smov 64   ;;  %s2955_s25 = smov 4  }
  0x28   : > { %2705 = dma.hbm_to_vmem [thread:$0]  (!%p3060_p10), %s3609_s4, 1024, %s281_s19, [#allocation6], %s3621_s24, %s3621_s24, %s2955_s25  }
  0x29   : > { %p58_p1 = scmp.eq.s32.totalorder %s57_s23, 0  ;;  %p67_p2 = scmp.ne.s32.totalorder %s2947_s11, %s2943_s10 }
  0x2a   : > { %p68_p4 = scmp.eq.s32.totalorder %s2951_s12, 0  ;;  %p2715_p6 = scmp.lt.s32.totalorder %s2951_s12, 4 }
  0x2b   : > { %s3094_s28 = scalar_select %p58_p1, %s2947_s11, %s60_s22  }
  0x2c   : > { %p69_p8 = por %p68_p4, %p67_p2  ;;  %p3628_p11 = scmp.eq.s32.totalorder %s3033_s13, 3 }
  0x2d   : > { %s312_s20 = sand.u32 1, %s2947_s11   ;;  %s2170_s14 = sshll.u32 %s2951_s12, 12 }
  0x2e   : > { %p3098_p12 = por %p3628_p11, %p67_p2  ;;  %s2101_s18 = sshll.u32 %s312_s20, 8 }
  0x2f   : > { %s3107_s26 = scalar_lea.hbm %s3606_s1, %s2170_s14  ;;  %s316_s19 = scalar_lea.vmem [#allocation2], %s2101_s18 }
  0x30   : > { %s323_s22 = sshll.u32 %s316_s19, 4  ;;  %p3109_p10 = pnand %p2715_p6, %p69_p8  ;;  %s3113_s22 = int_to_ptr.vmem [resolvable:$true] %s323_s22 }
  0x31   : > { %s3115_s27 = scalar_lea.sflag [#allocation3], %s312_s20  ;;  %s2851_s24 = scalar_lea.hbm %s3107_s26, 4096 }
  0x32   : > { %p2852_p13 = scmp.ne.s32.totalorder %s3107_s26, %s2851_s24  ;;  %p2853_p0 = pneg %p3109_p10 }
  0x33   : > { %s2856_s14 = scalar_lea.hbm %s3606_s1, 16384  ;;  %p2857_p7 = scmp.lt.u32.totalorder %s3107_s26, %s3606_s1 }
  0x34   : > { %p2854_p3 = pnand %p2853_p0, %p2852_p13  ;;  %p2858_p9 = scmp.lt.u32.totalorder %s2856_s14, %s2851_s24 }
  0x35   : > { %p2860_p2 = scmp.lt.u32.totalorder %s2851_s24, %s3107_s26 }
  0x36   : > { %p2855_p5 = pneg %p2854_p3  ;;  %p2859_p1 = por %p2858_p9, %p2857_p7 }
  0x38   : > { %p2861_p4 = por %p2860_p2, %p2859_p1 }
  0x3a   : > { %p2862_p6 = pnand %p2861_p4, %p2855_p5 }
  0x3c   : > { %2865 = shalt.err (!%p2862_p6)
}
  0x3d   : > { %s2866_s20 = scalar_lea.vmem %s3113_s22, 4096  ;;  %s2956_s16 = smov [#allocation2]  }
  0x3e   : > { %p2867_p8 = scmp.ne.s32.totalorder %s3113_s22, %s2866_s20  ;;  %s2871_s21 = sshll.u32 %s2956_s16, 4  ;;  %s2872_s21 = int_to_ptr.vmem [resolvable:$false] %s2871_s21 }
  0x3f   : > { %s2873_s18 = scalar_lea.vmem %s2872_s21, 8192  ;;  %p2874_p3 = scmp.lt.s32.totalorder %s3113_s22, %s2872_s21 }
  0x40   : > { %p2869_p11 = pnand %p2867_p8, %p2853_p0  ;;  %p2875_p7 = scmp.lt.s32.totalorder %s2873_s18, %s2866_s20 }
  0x42   : > { %p2870_p13 = pneg %p2869_p11  ;;  %p2876_p9 = por %p2875_p7, %p2874_p3 }
  0x44   : > { %p2877_p1 = pnand %p2876_p9, %p2870_p13 }
  0x46   : > { %2880 = shalt.err (!%p2877_p1)
}
  0x47   : > { %s3631_s24 = smov 64   ;;  %p3632_p0 = scmp.ne.s32.totalorder %s3625_s17, 0 }
  0x48   : > { %2709 = dma.hbm_to_vmem [thread:$0]  (!%p3109_p10), %s3107_s26, 4096, %s3113_s22, %s3115_s27, %s3631_s24, %s3631_s24, %s2955_s25  }
  0x49   : > { %335 = sbr.rel (%p3632_p0) target bundleno = 1491 (0x5d3), region = 52  ;;  %s3149_s14 = sand.u32 (!%p3632_p0), 1, %s2943_s10  }
  0x4a   : > { %s2105_s19 = sshll.u32 (!%p3632_p0), %s3149_s14, 8  ;;  %s338_s20 = scalar_lea.sflag (!%p3632_p0), [#allocation3], %s3149_s14 }
  0x4b   : > { %s3153_s16 = scalar_lea.vmem (!%p3632_p0), [#allocation2], %s2105_s19  ;;  %p3633_p5 = scmp.ne.s32.totalorder (!%p3632_p0), %s3622_s15, 0 }
  0x50   : > { %2926 = dma.done.wait (%p3633_p5), %s338_s20, 4096  }
  0x51   : > { %2928 = vsyncadd (%p3633_p5), %s338_s20, 4294963200  ;;  %p3634_p10 = scmp.eq.s32.totalorder %s3033_s13, 0 }
  0x53   : > { %2930 = dma.done.wait (%p3634_p10), [#allocation6], 1024   ;;  %p3635_p2 = pmov %p3634_p10 }
  0x54   : > { %s2108_s17 = sshll.u32 %s3033_s13, 2  ;;  %v2757_v0 = vld [vmem:[%s3607_s2] sm:$0xff]   ;;  %v2758_v1 = vld [vmem:[%s3607_s2 + $0x8] sm:$0xff]   ;;  %v2759_v2 = vld [vmem:[%s3607_s2 + $0x10] sm:$0xff]   ;;  %vm2958_vm0 = vmmov 0   ;;  %s2171_s22 = sshll.u32 %s3033_s13, 9 }
  0x55   : > { %2932 = vsyncadd (%p3635_p2), [#allocation6], 4294966272  ;;  %p391_p4 = scmp.lt.s32.totalorder %s2108_s17, 15  ;;  %2328 = vmatprep.subr.bf16.mxu0 %v2757_v0  ;;  %v2760_v3 = vld [vmem:[%s3607_s2 + $0x18] sm:$0xff]   ;;  %v2761_v5 = vld [vmem:[%s3607_s2 + $0x20] sm:$0xff]   ;;  %s1955_s21 = scalar_lea.sflag [#allocation4], %s3149_s14 }
  0x56   : > { %2329 = vmatpush3.bf16.msra.mxu0 %v2757_v0  ;;  %v2762_v6 = vld [vmem:[%s3607_s2 + $0x28] sm:$0xff]   ;;  %v2763_v7 = vld [vmem:[%s3607_s2 + $0x30] sm:$0xff]   ;;  %v2764_v8 = vld [vmem:[%s3607_s2 + $0x38] sm:$0xff]   ;;  %s2959_s24 = smov [#allocation7]  }
  0x57   : > { %s3643_s17 = smov (!%p391_p4, %s2108_s17), 15  ;;  %2330 = vmatprep.subr.bf16.mxu0 %v2758_v1  ;;  %v2767_v10 = vld [vmem:[%s3153_s16] sm:$0xff]   ;;  %v3197_v12 = vld [vmem:[#allocation5 + $0x8] sm:$0xff]   ;;  %v3203_v14 = vld [vmem:[#allocation5 + $0x10] sm:$0xff]  }
  0x58   : > { %s2109_s15 = sshll.u32 %s3643_s17, 2  ;;  %v3195_v11 = vld [vmem:[#allocation5] sm:$0xff]   ;;  %v2768_v13 = vld [vmem:[%s3153_s16 + $0x8] sm:$0xff]   ;;  %v2769_v15 = vld [vmem:[%s3153_s16 + $0x10] sm:$0xff]  }
  0x59   : > { %s394_s19 = scalar_lea.vmem %s3605_s0, %s2109_s15  ;;  %2348 = vmatprep.subr.bf16.mxu1 %v3195_v11  ;;  %v3208_v16 = vld [vmem:[#allocation5 + $0x18] sm:$0xff]   ;;  %v3213_v18 = vld [vmem:[#allocation5 + $0x20] sm:$0xff]   ;;  %v3218_v20 = vld [vmem:[#allocation5 + $0x28] sm:$0xff]   ;;  %s3558_s15 = scalar_lea.hbm %s3613_s8, %s2171_s22 }
  0x5a   : > { %2331 = vmatpush3.bf16.msra.mxu0 %v2758_v1  ;;  %v2765_v4 = vld [vmem:[%s394_s19] sm:$0xff]   ;;  %v2766_v9 = vld [vmem:[%s394_s19 + $0x8] sm:$0xff]   ;;  %2349 = vmatpush3.bf16.msra.mxu1 %v3195_v11  ;;  %v2770_v17 = vld [vmem:[%s3153_s16 + $0x18] sm:$0xff]   ;;  %s2885_s19 = sshll.u32 %s2959_s24, 4  ;;  %s2886_s19 = int_to_ptr.vmem [resolvable:$false] %s2885_s19 }
  0x5b   : > { %2332 = vmatprep.subr.bf16.mxu0 %v2759_v2  ;;  %2344 = vmatprep.mubr.bf16.mxu0 %v2765_v4  ;;  %v2771_v19 = vld [vmem:[%s3153_s16 + $0x20] sm:$0xff]   ;;  %v2772_v21 = vld [vmem:[%s3153_s16 + $0x28] sm:$0xff]   ;;  %v2773_v22 = vld [vmem:[%s3153_s16 + $0x30] sm:$0xff]   ;;  %s2887_s20 = scalar_lea.vmem %s2886_s19, 1024 }
  0x5c   : > { %2350 = vmatprep.subr.bf16.mxu1 %v3197_v12  ;;  %v2774_v23 = vld [vmem:[%s3153_s16 + $0x38] sm:$0xff]   ;;  %v2775_v24 = vld [vmem:[%s3153_s16 + $0x40] sm:$0xff]   ;;  %v2776_v25 = vld [vmem:[%s3153_s16 + $0x48] sm:$0xff]  }
  0x5d   : > { %v2777_v26 = vld [vmem:[%s3153_s16 + $0x50] sm:$0xff]   ;;  %v2778_v27 = vld [vmem:[%s3153_s16 + $0x58] sm:$0xff]   ;;  %v2779_v28 = vld [vmem:[%s3153_s16 + $0x60] sm:$0xff]  }
  0x5e   : > { %2333 = vmatpush3.bf16.msra.mxu0 %v2759_v2  ;;  %2351 = vmatpush3.bf16.msra.mxu1 %v3197_v12  ;;  %v2780_v29 = vld [vmem:[%s3153_s16 + $0x68] sm:$0xff]   ;;  %v2781_v30 = vld [vmem:[%s3153_s16 + $0x70] sm:$0xff]   ;;  %v2782_v31 = vld [vmem:[%s3153_s16 + $0x78] sm:$0xff]  }
  0x5f   : > { %2334 = vmatprep.subr.bf16.mxu0 %v2760_v3  ;;  %2352 = vmatprep.subr.bf16.mxu1 %v3203_v14  ;;  %v3234_v32 = vld [vmem:[#allocation5 + $0x30] sm:$0xff]   ;;  %v2783_v33 = vld [vmem:[%s3153_s16 + $0x80] sm:$0xff]   ;;  %v3239_v34 = vld [vmem:[#allocation5 + $0x38] sm:$0xff]  }
  0x60   : > { %v2784_v35 = vld [vmem:[%s3153_s16 + $0x88] sm:$0xff]   ;;  %v2785_v36 = vld [vmem:[%s3153_s16 + $0x90] sm:$0xff]   ;;  %v2786_v37 = vld [vmem:[%s3153_s16 + $0x98] sm:$0xff]  }
  0x61   : > { %v2787_v38 = vld [vmem:[%s3153_s16 + $0xa0] sm:$0xff]   ;;  %v2788_v39 = vld [vmem:[%s3153_s16 + $0xa8] sm:$0xff]   ;;  %v2789_v40 = vld [vmem:[%s3153_s16 + $0xb0] sm:$0xff]  }
  0x62   : > { %2335 = vmatpush3.bf16.msra.mxu0 %v2760_v3  ;;  %2353 = vmatpush3.bf16.msra.mxu1 %v3203_v14  ;;  %v2790_v41 = vld [vmem:[%s3153_s16 + $0xb8] sm:$0xff]   ;;  %v2791_v42 = vld [vmem:[%s3153_s16 + $0xc0] sm:$0xff]   ;;  %v2792_v43 = vld [vmem:[%s3153_s16 + $0xc8] sm:$0xff]  }
  0x63   : > { %2336 = vmatprep.subr.bf16.mxu0 %v2761_v5  ;;  %2354 = vmatprep.subr.bf16.mxu1 %v3208_v16  ;;  %v2793_v44 = vld [vmem:[%s3153_s16 + $0xd0] sm:$0xff]   ;;  %v2794_v45 = vld [vmem:[%s3153_s16 + $0xd8] sm:$0xff]   ;;  %v2795_v46 = vld [vmem:[%s3153_s16 + $0xe0] sm:$0xff]  }
  0x64   : > { %v2796_v47 = vld [vmem:[%s3153_s16 + $0xe8] sm:$0xff]   ;;  %v2797_v48 = vld [vmem:[%s3153_s16 + $0xf0] sm:$0xff]   ;;  %v2798_v49 = vld [vmem:[%s3153_s16 + $0xf8] sm:$0xff]   ;;  %s2107_s16 = sshll.u32 %s3149_s14, 5 }
  0x65   : > { %v3262_v50 = vld [vmem:[%s3608_s3] ss:$0 sm:$0xff]  ;;  %s382_s25 = scalar_lea.vmem [#allocation7], %s2107_s16 }
  0x66   : > { %2337 = vmatpush3.bf16.msra.mxu0 %v2761_v5  ;;  %2355 = vmatpush3.bf16.msra.mxu1 %v3208_v16  ;;  %s1973_s26 = sshll.u32 %s382_s25, 4  ;;  %s3552_s26 = int_to_ptr.vmem [resolvable:$true] %s1973_s26 }
  0x67   : > { %2338 = vmatprep.subr.bf16.mxu0 %v2762_v6  ;;  %2356 = vmatprep.subr.bf16.mxu1 %v3213_v18  ;;  %s2881_s18 = scalar_lea.vmem %s3552_s26, 512  ;;  %p2888_p13 = scmp.lt.s32.totalorder %s3552_s26, %s2886_s19 }
  0x68   : > { %p2882_p6 = scmp.ne.s32.totalorder %s3552_s26, %s2881_s18  ;;  %p2889_p3 = scmp.lt.s32.totalorder %s2887_s20, %s2881_s18 }
  0x6a   : > { %2339 = vmatpush3.bf16.msra.mxu0 %v2762_v6  ;;  %2357 = vmatpush3.bf16.msra.mxu1 %v3213_v18  ;;  %p2883_p8 = pnand %p2882_p6, %p3098_p12  ;;  %p2890_p7 = por %p2889_p3, %p2888_p13 }
  0x6b   : > { %2340 = vmatprep.subr.bf16.mxu0 %v2763_v7  ;;  %2358 = vmatprep.subr.bf16.mxu1 %v3218_v20 }
  0x6c   : > { %p2884_p11 = pneg %p2883_p8 }
  0x6e   : > { %2341 = vmatpush3.bf16.msra.mxu0 %v2763_v7  ;;  %2359 = vmatpush3.bf16.msra.mxu1 %v3218_v20  ;;  %p2891_p9 = pnand %p2890_p7, %p2884_p11 }
  0x6f   : > { %2342 = vmatprep.subr.bf16.mxu0 %v2764_v8  ;;  %2360 = vmatprep.subr.bf16.mxu1 %v3234_v32 }
  0x72   : > { %2343 = vmatpush3.bf16.msra.mxu0 %v2764_v8  ;;  %2361 = vmatpush3.bf16.msra.mxu1 %v3234_v32 }
  0x73   : > { %2368 = vmatprep.subr.bf16.mxu0 %v2757_v0  ;;  %2362 = vmatprep.subr.bf16.mxu1 %v3239_v34 }
  0x75   : > { %2345 = vmatmul.mubr.bf16.vlgmr.msra.gmra.mrb[0].mxu0 %v2766_v9 }
  0x76   : > { %2369 = vmatpush3.bf16.msra.mxu0 %v2757_v0  ;;  %2384 = vmatprep.mubr.bf16.mxu0 %v2767_v10 }
  0x77   : > { %2370 = vmatprep.subr.bf16.mxu0 %v2758_v1  ;;  %2363 = vmatpush3.bf16.msra.mxu1 %v3239_v34 }
  0x78   : > { %2448 = vmatprep.subr.bf16.mxu1 %v3195_v11 }
  0x7a   : > { %2371 = vmatpush3.bf16.msra.mxu0 %v2758_v1 }
  0x7b   : > { %2372 = vmatprep.subr.bf16.mxu0 %v2759_v2 }
  0x7e   : > { %2373 = vmatpush3.bf16.msra.mxu0 %v2759_v2 }
  0x7f   : > { %2374 = vmatprep.subr.bf16.mxu0 %v2760_v3 }
  0x82   : > { %2375 = vmatpush3.bf16.msra.mxu0 %v2760_v3 }
  0x83   : > { %2376 = vmatprep.subr.bf16.mxu0 %v2761_v5 }
  0x86   : > { %2377 = vmatpush3.bf16.msra.mxu0 %v2761_v5 }
  0x87   : > { %2378 = vmatprep.subr.bf16.mxu0 %v2762_v6 }
  0x8a   : > { %2379 = vmatpush3.bf16.msra.mxu0 %v2762_v6 }
  0x8b   : > { %2380 = vmatprep.subr.bf16.mxu0 %v2763_v7 }
  0x8e   : > { %2381 = vmatpush3.bf16.msra.mxu0 %v2763_v7 }
  0x8f   : > { %2382 = vmatprep.subr.bf16.mxu0 %v2764_v8 }
  0x92   : > { %2383 = vmatpush3.bf16.msra.mxu0 %v2764_v8 }
  0x95   : > { %2385 = vmatmul.mubr.bf16.vlgmr.msra.gmra.mrb[4].mxu0 %v2768_v13 }
  0x96   : > { %2388 = vmatprep.mubr.bf16.mxu0 %v2769_v15 }
  0x9d   : > { %2389 = vmatmul.mubr.bf16.gmra.mrb[8].mxu0 %v2770_v17 }
  0x9e   : > { %2392 = vmatprep.mubr.bf16.mxu0 %v2771_v19 }
  0xa5   : > { %2393 = vmatmul.mubr.bf16.gmra.mrb[12].mxu0 %v2772_v21 }
  0xa6   : > { %2396 = vmatprep.mubr.bf16.mxu0 %v2773_v22 }
  0xad   : > { %2397 = vmatmul.mubr.bf16.gmra.mrb[16].mxu0 %v2774_v23 }
  0xae   : > { %2400 = vmatprep.mubr.bf16.mxu0 %v2775_v24 }
  0xb5   : > { %2401 = vmatmul.mubr.bf16.gmra.mrb[20].mxu0 %v2776_v25 }
  0xb6   : > { %2404 = vmatprep.mubr.bf16.mxu0 %v2777_v26 }
  0xbd   : > { %2405 = vmatmul.mubr.bf16.gmra.mrb[24].mxu0 %v2778_v27 }
  0xbe   : > { %2408 = vmatprep.mubr.bf16.mxu0 %v2779_v28 }
  0xc5   : > { %2409 = vmatmul.mubr.bf16.gmra.mrb[28].mxu0 %v2780_v29 }
  0xc6   : > { %2412 = vmatprep.mubr.bf16.mxu0 %v2781_v30 }
  0xcd   : > { %2413 = vmatmul.mubr.bf16.gmra.mrb[32].mxu0 %v2782_v31 }
  0xce   : > { %2416 = vmatprep.mubr.bf16.mxu0 %v2783_v33 }
  0xd5   : > { %2417 = vmatmul.mubr.bf16.gmra.mrb[36].mxu0 %v2784_v35 }
  0xd6   : > { %2420 = vmatprep.mubr.bf16.mxu0 %v2785_v36 }
  0xdd   : > { %2421 = vmatmul.mubr.bf16.gmra.mrb[40].mxu0 %v2786_v37 }
  0xde   : > { %2424 = vmatprep.mubr.bf16.mxu0 %v2787_v38 }
  0xe5   : > { %2425 = vmatmul.mubr.bf16.gmra.mrb[44].mxu0 %v2788_v39 }
  0xe6   : > { %2428 = vmatprep.mubr.bf16.mxu0 %v2789_v40 }
  0xed   : > { %2429 = vmatmul.mubr.bf16.gmra.mrb[48].mxu0 %v2790_v41 }
  0xee   : > { %2432 = vmatprep.mubr.bf16.mxu0 %v2791_v42 }
  0xf5   : > { %2433 = vmatmul.mubr.bf16.gmra.mrb[52].mxu0 %v2792_v43 }
  0xf6   : > { %2436 = vmatprep.mubr.bf16.mxu0 %v2793_v44 }
  0xfd   : > { %2437 = vmatmul.mubr.bf16.gmra.mrb[56].mxu0 %v2794_v45 }
  0xfe   : > { %2440 = vmatprep.mubr.bf16.mxu0 %v2795_v46 }
 0x105   : > { %2441 = vmatmul.mubr.bf16.gmra.mrb[60].mxu0 %v2796_v47 }
 0x106   : > { %2444 = vmatprep.mubr.bf16.mxu0 %v2797_v48 }
 0x10d   : > { %2445 = vmatmul.mubr.bf16.gmra.mrb[64].mxu0 %v2798_v49 }
 0x148   : > { %v2346_v51 = vpop.f32.mrb[0].mxu0 }
 0x149   : > { %v552_v52 = vadd.f32 %v2346_v51, %v3262_v50  ;;  %v543_v53 = vpop.f32.mrb[1].mxu0 }
 0x14a   : > { %v544_v54 = vadd.f32 %v3262_v50, %v543_v53  ;;  %v2347_v55 = vpop.f32.mrb[2].mxu0 }
 0x14b   : > { %v560_v56 = vmax.f32 %v552_v52, 0.0  ;;  %v555_v57 = vadd.f32 %v2347_v55, %v3262_v50  ;;  %v546_v58 = vpop.f32.mrb[3].mxu0 }
 0x14c   : > { %v547_v59 = vadd.f32 %v3262_v50, %v546_v58  ;;  %v558_v61 = vmax.f32 %v544_v54, 0.0 }
 0x14d   : > { %v561_v60 = vmax.f32 %v555_v57, 0.0 }
 0x14e   : > { %v559_v62 = vmax.f32 %v547_v59, 0.0 }
 0x14f   : > { %v563_v63 = vpack.c.bf16 %v561_v60, %v560_v56 }
 0x150   : > { %v562_v0 = vpack.c.bf16 %v559_v62, %v558_v61 }
 0x152   : > { %2364 = vmatprep.mubr.bf16.mxu1 %v562_v0 }
 0x153   : > { %2365 = vmatmul.mubr.bf16.vlgmr.msra.gmra.mrb[0].mxu1 %v563_v63 }
 0x154   : > { %2449 = vmatpush3.bf16.msra.mxu1 %v3195_v11 }
 0x155   : > { %2450 = vmatprep.subr.bf16.mxu1 %v3197_v12 }
 0x158   : > { %2451 = vmatpush3.bf16.msra.mxu1 %v3197_v12 }
 0x159   : > { %2452 = vmatprep.subr.bf16.mxu1 %v3203_v14 }
 0x15c   : > { %2453 = vmatpush3.bf16.msra.mxu1 %v3203_v14 }
 0x15d   : > { %2454 = vmatprep.subr.bf16.mxu1 %v3208_v16 }
 0x160   : > { %2455 = vmatpush3.bf16.msra.mxu1 %v3208_v16 }
 0x161   : > { %2456 = vmatprep.subr.bf16.mxu1 %v3213_v18 }
 0x164   : > { %2457 = vmatpush3.bf16.msra.mxu1 %v3213_v18 }
 0x165   : > { %2458 = vmatprep.subr.bf16.mxu1 %v3218_v20 }
 0x168   : > { %v2386_v1 = vpop.f32.mrb[4].mxu0  ;;  %2459 = vmatpush3.bf16.msra.mxu1 %v3218_v20 }
 0x169   : > { %v966_v2 = vadd.f32 %v2386_v1, %v3262_v50  ;;  %v957_v3 = vpop.f32.mrb[5].mxu0  ;;  %2460 = vmatprep.subr.bf16.mxu1 %v3234_v32 }
 0x16a   : > { %v958_v4 = vadd.f32 %v3262_v50, %v957_v3  ;;  %v2387_v5 = vpop.f32.mrb[6].mxu0 }
 0x16b   : > { %v969_v6 = vadd.f32 %v2387_v5, %v3262_v50  ;;  %v960_v7 = vpop.f32.mrb[7].mxu0  ;;  %v1214_v9 = vmax.f32 %v966_v2, 0.0 }
 0x16c   : > { %v961_v8 = vadd.f32 %v3262_v50, %v960_v7  ;;  %2461 = vmatpush3.bf16.msra.mxu1 %v3234_v32  ;;  %v1212_v11 = vmax.f32 %v958_v4, 0.0 }
 0x16d   : > { %v1215_v10 = vmax.f32 %v969_v6, 0.0  ;;  %2462 = vmatprep.subr.bf16.mxu1 %v3239_v34 }
 0x16e   : > { %v1213_v12 = vmax.f32 %v961_v8, 0.0 }
 0x16f   : > { %v1277_v13 = vpack.c.bf16 %v1215_v10, %v1214_v9 }
 0x170   : > { %v1276_v14 = vpack.c.bf16 %v1213_v12, %v1212_v11  ;;  %v2390_v15 = vpop.f32.mrb[8].mxu0  ;;  %2463 = vmatpush3.bf16.msra.mxu1 %v3239_v34 }
 0x171   : > { %v982_v16 = vadd.f32 %v2390_v15, %v3262_v50  ;;  %v973_v17 = vpop.f32.mrb[9].mxu0 }
 0x172   : > { %v974_v18 = vadd.f32 %v3262_v50, %v973_v17  ;;  %v2391_v19 = vpop.f32.mrb[10].mxu0  ;;  %2464 = vmatprep.mubr.bf16.mxu1 %v1276_v14 }
 0x173   : > { %v985_v20 = vadd.f32 %v2391_v19, %v3262_v50  ;;  %v976_v21 = vpop.f32.mrb[11].mxu0  ;;  %2465 = vmatmul.mubr.bf16.vlgmr.msra.gmra.mrb[4].mxu1 %v1277_v13  ;;  %v1218_v23 = vmax.f32 %v982_v16, 0.0 }
 0x174   : > { %v977_v22 = vadd.f32 %v3262_v50, %v976_v21  ;;  %v1216_v25 = vmax.f32 %v974_v18, 0.0 }
 0x175   : > { %v1219_v24 = vmax.f32 %v985_v20, 0.0 }
 0x176   : > { %v1217_v26 = vmax.f32 %v977_v22, 0.0 }
 0x177   : > { %v1279_v27 = vpack.c.bf16 %v1219_v24, %v1218_v23 }
 0x178   : > { %v1278_v28 = vpack.c.bf16 %v1217_v26, %v1216_v25  ;;  %v2394_v29 = vpop.f32.mrb[12].mxu0 }
 0x179   : > { %v998_v30 = vadd.f32 %v2394_v29, %v3262_v50  ;;  %v989_v31 = vpop.f32.mrb[13].mxu0 }
 0x17a   : > { %v990_v32 = vadd.f32 %v3262_v50, %v989_v31  ;;  %v2395_v33 = vpop.f32.mrb[14].mxu0  ;;  %2468 = vmatprep.mubr.bf16.mxu1 %v1278_v28 }
 0x17b   : > { %v1001_v34 = vadd.f32 %v2395_v33, %v3262_v50  ;;  %v992_v35 = vpop.f32.mrb[15].mxu0  ;;  %2469 = vmatmul.mubr.bf16.gmra.mrb[8].mxu1 %v1279_v27  ;;  %v1222_v37 = vmax.f32 %v998_v30, 0.0 }
 0x17c   : > { %v993_v36 = vadd.f32 %v3262_v50, %v992_v35  ;;  %v1220_v39 = vmax.f32 %v990_v32, 0.0 }
 0x17d   : > { %v1223_v38 = vmax.f32 %v1001_v34, 0.0 }
 0x17e   : > { %v1221_v40 = vmax.f32 %v993_v36, 0.0 }
 0x17f   : > { %v1281_v41 = vpack.c.bf16 %v1223_v38, %v1222_v37 }
 0x180   : > { %v1280_v42 = vpack.c.bf16 %v1221_v40, %v1220_v39  ;;  %v2398_v43 = vpop.f32.mrb[16].mxu0 }
 0x181   : > { %v1014_v44 = vadd.f32 %v2398_v43, %v3262_v50  ;;  %v1005_v45 = vpop.f32.mrb[17].mxu0 }
 0x182   : > { %v1006_v46 = vadd.f32 %v3262_v50, %v1005_v45  ;;  %v2399_v47 = vpop.f32.mrb[18].mxu0  ;;  %2472 = vmatprep.mubr.bf16.mxu1 %v1280_v42 }
 0x183   : > { %v1017_v48 = vadd.f32 %v2399_v47, %v3262_v50  ;;  %v1008_v49 = vpop.f32.mrb[19].mxu0  ;;  %2473 = vmatmul.mubr.bf16.gmra.mrb[12].mxu1 %v1281_v41  ;;  %v1226_v52 = vmax.f32 %v1014_v44, 0.0 }
 0x184   : > { %v1009_v51 = vadd.f32 %v3262_v50, %v1008_v49  ;;  %v1224_v54 = vmax.f32 %v1006_v46, 0.0 }
 0x185   : > { %v1227_v53 = vmax.f32 %v1017_v48, 0.0 }
 0x186   : > { %v1225_v55 = vmax.f32 %v1009_v51, 0.0 }
 0x187   : > { %v1283_v56 = vpack.c.bf16 %v1227_v53, %v1226_v52 }
 0x188   : > { %v1282_v57 = vpack.c.bf16 %v1225_v55, %v1224_v54  ;;  %v2402_v58 = vpop.f32.mrb[20].mxu0 }
 0x189   : > { %v1030_v59 = vadd.f32 %v2402_v58, %v3262_v50  ;;  %v1021_v60 = vpop.f32.mrb[21].mxu0 }
 0x18a   : > { %v1022_v61 = vadd.f32 %v3262_v50, %v1021_v60  ;;  %v2403_v62 = vpop.f32.mrb[22].mxu0  ;;  %2476 = vmatprep.mubr.bf16.mxu1 %v1282_v57 }
 0x18b   : > { %v1033_v63 = vadd.f32 %v2403_v62, %v3262_v50  ;;  %v1024_v0 = vpop.f32.mrb[23].mxu0  ;;  %2477 = vmatmul.mubr.bf16.gmra.mrb[16].mxu1 %v1283_v56  ;;  %v1230_v2 = vmax.f32 %v1030_v59, 0.0 }
 0x18c   : > { %v1025_v1 = vadd.f32 %v3262_v50, %v1024_v0  ;;  %v1228_v4 = vmax.f32 %v1022_v61, 0.0 }
 0x18d   : > { %v1231_v3 = vmax.f32 %v1033_v63, 0.0 }
 0x18e   : > { %v1229_v5 = vmax.f32 %v1025_v1, 0.0 }
 0x18f   : > { %v1285_v6 = vpack.c.bf16 %v1231_v3, %v1230_v2 }
 0x190   : > { %v1284_v7 = vpack.c.bf16 %v1229_v5, %v1228_v4  ;;  %v2406_v8 = vpop.f32.mrb[24].mxu0 }
 0x191   : > { %v1046_v9 = vadd.f32 %v2406_v8, %v3262_v50  ;;  %v1037_v10 = vpop.f32.mrb[25].mxu0 }
 0x192   : > { %v1038_v11 = vadd.f32 %v3262_v50, %v1037_v10  ;;  %v2407_v12 = vpop.f32.mrb[26].mxu0  ;;  %2480 = vmatprep.mubr.bf16.mxu1 %v1284_v7 }
 0x193   : > { %v1049_v13 = vadd.f32 %v2407_v12, %v3262_v50  ;;  %v1040_v14 = vpop.f32.mrb[27].mxu0  ;;  %2481 = vmatmul.mubr.bf16.gmra.mrb[20].mxu1 %v1285_v6  ;;  %v1234_v16 = vmax.f32 %v1046_v9, 0.0 }
 0x194   : > { %v1041_v15 = vadd.f32 %v3262_v50, %v1040_v14  ;;  %v1232_v18 = vmax.f32 %v1038_v11, 0.0 }
 0x195   : > { %v1235_v17 = vmax.f32 %v1049_v13, 0.0 }
 0x196   : > { %v1233_v19 = vmax.f32 %v1041_v15, 0.0 }
 0x197   : > { %v1287_v20 = vpack.c.bf16 %v1235_v17, %v1234_v16 }
 0x198   : > { %v1286_v21 = vpack.c.bf16 %v1233_v19, %v1232_v18  ;;  %v2410_v22 = vpop.f32.mrb[28].mxu0 }
 0x199   : > { %v1062_v23 = vadd.f32 %v2410_v22, %v3262_v50  ;;  %v1053_v24 = vpop.f32.mrb[29].mxu0 }
 0x19a   : > { %v1054_v25 = vadd.f32 %v3262_v50, %v1053_v24  ;;  %v2411_v26 = vpop.f32.mrb[30].mxu0  ;;  %2484 = vmatprep.mubr.bf16.mxu1 %v1286_v21 }
 0x19b   : > { %v1065_v27 = vadd.f32 %v2411_v26, %v3262_v50  ;;  %v1056_v28 = vpop.f32.mrb[31].mxu0  ;;  %2485 = vmatmul.mubr.bf16.gmra.mrb[24].mxu1 %v1287_v20  ;;  %v1238_v30 = vmax.f32 %v1062_v23, 0.0 }
 0x19c   : > { %v1057_v29 = vadd.f32 %v3262_v50, %v1056_v28  ;;  %v1236_v32 = vmax.f32 %v1054_v25, 0.0 }
 0x19d   : > { %v1239_v31 = vmax.f32 %v1065_v27, 0.0 }
 0x19e   : > { %v1237_v33 = vmax.f32 %v1057_v29, 0.0 }
 0x19f   : > { %v1289_v34 = vpack.c.bf16 %v1239_v31, %v1238_v30 }
 0x1a0   : > { %v1288_v35 = vpack.c.bf16 %v1237_v33, %v1236_v32  ;;  %v2414_v36 = vpop.f32.mrb[32].mxu0 }
 0x1a1   : > { %v1078_v37 = vadd.f32 %v2414_v36, %v3262_v50  ;;  %v1069_v38 = vpop.f32.mrb[33].mxu0 }
 0x1a2   : > { %v1070_v39 = vadd.f32 %v3262_v50, %v1069_v38  ;;  %v2415_v40 = vpop.f32.mrb[34].mxu0  ;;  %2488 = vmatprep.mubr.bf16.mxu1 %v1288_v35 }
 0x1a3   : > { %v1081_v41 = vadd.f32 %v2415_v40, %v3262_v50  ;;  %v1072_v42 = vpop.f32.mrb[35].mxu0  ;;  %2489 = vmatmul.mubr.bf16.gmra.mrb[28].mxu1 %v1289_v34  ;;  %v1242_v44 = vmax.f32 %v1078_v37, 0.0 }
 0x1a4   : > { %v1073_v43 = vadd.f32 %v3262_v50, %v1072_v42  ;;  %v1240_v46 = vmax.f32 %v1070_v39, 0.0 }
 0x1a5   : > { %v1243_v45 = vmax.f32 %v1081_v41, 0.0 }
 0x1a6   : > { %v1241_v47 = vmax.f32 %v1073_v43, 0.0 }
 0x1a7   : > { %v1291_v48 = vpack.c.bf16 %v1243_v45, %v1242_v44 }
 0x1a8   : > { %v1290_v49 = vpack.c.bf16 %v1241_v47, %v1240_v46  ;;  %v2418_v51 = vpop.f32.mrb[36].mxu0 }
 0x1a9   : > { %v1094_v52 = vadd.f32 %v2418_v51, %v3262_v50  ;;  %v1085_v53 = vpop.f32.mrb[37].mxu0 }
 0x1aa   : > { %v1086_v54 = vadd.f32 %v3262_v50, %v1085_v53  ;;  %v2419_v55 = vpop.f32.mrb[38].mxu0  ;;  %2492 = vmatprep.mubr.bf16.mxu1 %v1290_v49 }
 0x1ab   : > { %v1097_v56 = vadd.f32 %v2419_v55, %v3262_v50  ;;  %v1088_v57 = vpop.f32.mrb[39].mxu0  ;;  %2493 = vmatmul.mubr.bf16.gmra.mrb[32].mxu1 %v1291_v48  ;;  %v1246_v59 = vmax.f32 %v1094_v52, 0.0 }
 0x1ac   : > { %v1089_v58 = vadd.f32 %v3262_v50, %v1088_v57  ;;  %v1244_v61 = vmax.f32 %v1086_v54, 0.0  ;;  %v2957_v54 = vmov 0.0  }
 0x1ad   : > { %v1247_v60 = vmax.f32 %v1097_v56, 0.0  ;;  %2528 = vmatprep.subr.bf16.mxu0 %v2957_v54  ;;  %2548 = vmatprep.subr.bf16.mxu1 %v2957_v54 }
 0x1ae   : > { %v1245_v62 = vmax.f32 %v1089_v58, 0.0  ;;  %2544 = vmatprep.mubr.msk.bf16.mxu0 %vm2958_vm0, %v2957_v54 }
 0x1af   : > { %v1293_v63 = vpack.c.bf16 %v1247_v60, %v1246_v59 }
 0x1b0   : > { %v1292_v0 = vpack.c.bf16 %v1245_v62, %v1244_v61  ;;  %v2422_v1 = vpop.f32.mrb[40].mxu0 }
 0x1b1   : > { %v1110_v2 = vadd.f32 %v2422_v1, %v3262_v50  ;;  %v1101_v3 = vpop.f32.mrb[41].mxu0 }
 0x1b2   : > { %v1102_v4 = vadd.f32 %v3262_v50, %v1101_v3  ;;  %v2423_v5 = vpop.f32.mrb[42].mxu0  ;;  %2496 = vmatprep.mubr.bf16.mxu1 %v1292_v0 }
 0x1b3   : > { %v1113_v6 = vadd.f32 %v2423_v5, %v3262_v50  ;;  %v1104_v7 = vpop.f32.mrb[43].mxu0  ;;  %2497 = vmatmul.mubr.bf16.gmra.mrb[36].mxu1 %v1293_v63  ;;  %v1250_v9 = vmax.f32 %v1110_v2, 0.0 }
 0x1b4   : > { %v1105_v8 = vadd.f32 %v3262_v50, %v1104_v7  ;;  %v1248_v11 = vmax.f32 %v1102_v4, 0.0 }
 0x1b5   : > { %v1251_v10 = vmax.f32 %v1113_v6, 0.0 }
 0x1b6   : > { %v1249_v12 = vmax.f32 %v1105_v8, 0.0 }
 0x1b7   : > { %v1295_v13 = vpack.c.bf16 %v1251_v10, %v1250_v9 }
 0x1b8   : > { %v1294_v14 = vpack.c.bf16 %v1249_v12, %v1248_v11  ;;  %v2426_v15 = vpop.f32.mrb[44].mxu0 }
 0x1b9   : > { %v1126_v16 = vadd.f32 %v2426_v15, %v3262_v50  ;;  %v1117_v17 = vpop.f32.mrb[45].mxu0 }
 0x1ba   : > { %v1118_v18 = vadd.f32 %v3262_v50, %v1117_v17  ;;  %v2427_v19 = vpop.f32.mrb[46].mxu0  ;;  %2500 = vmatprep.mubr.bf16.mxu1 %v1294_v14 }
 0x1bb   : > { %v1129_v20 = vadd.f32 %v2427_v19, %v3262_v50  ;;  %v1120_v21 = vpop.f32.mrb[47].mxu0  ;;  %2501 = vmatmul.mubr.bf16.gmra.mrb[40].mxu1 %v1295_v13  ;;  %v1254_v23 = vmax.f32 %v1126_v16, 0.0 }
 0x1bc   : > { %v1121_v22 = vadd.f32 %v3262_v50, %v1120_v21  ;;  %v1252_v25 = vmax.f32 %v1118_v18, 0.0 }
 0x1bd   : > { %v1255_v24 = vmax.f32 %v1129_v20, 0.0 }
 0x1be   : > { %v1253_v26 = vmax.f32 %v1121_v22, 0.0 }
 0x1bf   : > { %v1297_v27 = vpack.c.bf16 %v1255_v24, %v1254_v23 }
 0x1c0   : > { %v1296_v28 = vpack.c.bf16 %v1253_v26, %v1252_v25  ;;  %v2430_v29 = vpop.f32.mrb[48].mxu0 }
 0x1c1   : > { %v1142_v30 = vadd.f32 %v2430_v29, %v3262_v50  ;;  %v1133_v31 = vpop.f32.mrb[49].mxu0 }
 0x1c2   : > { %v1134_v32 = vadd.f32 %v3262_v50, %v1133_v31  ;;  %v2431_v33 = vpop.f32.mrb[50].mxu0  ;;  %2504 = vmatprep.mubr.bf16.mxu1 %v1296_v28 }
 0x1c3   : > { %v1145_v34 = vadd.f32 %v2431_v33, %v3262_v50  ;;  %v1136_v35 = vpop.f32.mrb[51].mxu0  ;;  %2505 = vmatmul.mubr.bf16.gmra.mrb[44].mxu1 %v1297_v27  ;;  %v1258_v37 = vmax.f32 %v1142_v30, 0.0 }
 0x1c4   : > { %v1137_v36 = vadd.f32 %v3262_v50, %v1136_v35  ;;  %v1256_v39 = vmax.f32 %v1134_v32, 0.0 }
 0x1c5   : > { %v1259_v38 = vmax.f32 %v1145_v34, 0.0 }
 0x1c6   : > { %v1257_v40 = vmax.f32 %v1137_v36, 0.0 }
 0x1c7   : > { %v1299_v41 = vpack.c.bf16 %v1259_v38, %v1258_v37 }
 0x1c8   : > { %v1298_v42 = vpack.c.bf16 %v1257_v40, %v1256_v39  ;;  %v2434_v43 = vpop.f32.mrb[52].mxu0 }
 0x1c9   : > { %v1158_v44 = vadd.f32 %v2434_v43, %v3262_v50  ;;  %v1149_v45 = vpop.f32.mrb[53].mxu0 }
 0x1ca   : > { %v1150_v46 = vadd.f32 %v3262_v50, %v1149_v45  ;;  %v2435_v47 = vpop.f32.mrb[54].mxu0  ;;  %2508 = vmatprep.mubr.bf16.mxu1 %v1298_v42  ;;  %v3364_v42 = vld [vmem:[%s3610_s5] ss:$0 sm:$0xff] }
 0x1cb   : > { %v1161_v48 = vadd.f32 %v2435_v47, %v3262_v50  ;;  %v1152_v49 = vpop.f32.mrb[55].mxu0  ;;  %2509 = vmatmul.mubr.bf16.gmra.mrb[48].mxu1 %v1299_v41  ;;  %v1262_v52 = vmax.f32 %v1158_v44, 0.0 }
 0x1cc   : > { %v1153_v51 = vadd.f32 %v3262_v50, %v1152_v49  ;;  %v1260_v55 = vmax.f32 %v1150_v46, 0.0 }
 0x1cd   : > { %v1263_v53 = vmax.f32 %v1161_v48, 0.0 }
 0x1ce   : > { %v1261_v56 = vmax.f32 %v1153_v51, 0.0 }
 0x1cf   : > { %v1301_v57 = vpack.c.bf16 %v1263_v53, %v1262_v52 }
 0x1d0   : > { %v1300_v58 = vpack.c.bf16 %v1261_v56, %v1260_v55  ;;  %v2438_v59 = vpop.f32.mrb[56].mxu0 }
 0x1d1   : > { %v1174_v60 = vadd.f32 %v2438_v59, %v3262_v50  ;;  %v1165_v61 = vpop.f32.mrb[57].mxu0 }
 0x1d2   : > { %2512 = vmatprep.mubr.bf16.mxu1 %v1300_v58  ;;  %v1166_v62 = vadd.f32 %v3262_v50, %v1165_v61  ;;  %v2439_v63 = vpop.f32.mrb[58].mxu0 }
 0x1d3   : > { %2513 = vmatmul.mubr.bf16.gmra.mrb[52].mxu1 %v1301_v57  ;;  %v1266_v0 = vmax.f32 %v1174_v60, 0.0  ;;  %v1177_v1 = vadd.f32 %v2439_v63, %v3262_v50  ;;  %v1168_v2 = vpop.f32.mrb[59].mxu0 }
 0x1d4   : > { %v1264_v3 = vmax.f32 %v1166_v62, 0.0  ;;  %v1169_v4 = vadd.f32 %v3262_v50, %v1168_v2 }
 0x1d5   : > { %v1267_v5 = vmax.f32 %v1177_v1, 0.0 }
 0x1d6   : > { %v1265_v6 = vmax.f32 %v1169_v4, 0.0 }
 0x1d7   : > { %v1303_v7 = vpack.c.bf16 %v1267_v5, %v1266_v0 }
 0x1d8   : > { %v1302_v8 = vpack.c.bf16 %v1265_v6, %v1264_v3  ;;  %v2442_v9 = vpop.f32.mrb[60].mxu0 }
 0x1d9   : > { %v1190_v10 = vadd.f32 %v2442_v9, %v3262_v50  ;;  %v1181_v11 = vpop.f32.mrb[61].mxu0 }
 0x1da   : > { %2516 = vmatprep.mubr.bf16.mxu1 %v1302_v8  ;;  %v1182_v12 = vadd.f32 %v3262_v50, %v1181_v11  ;;  %v2443_v13 = vpop.f32.mrb[62].mxu0 }
 0x1db   : > { %2517 = vmatmul.mubr.bf16.gmra.mrb[56].mxu1 %v1303_v7  ;;  %v1270_v14 = vmax.f32 %v1190_v10, 0.0  ;;  %v1193_v15 = vadd.f32 %v2443_v13, %v3262_v50  ;;  %v1184_v16 = vpop.f32.mrb[63].mxu0 }
 0x1dc   : > { %v1268_v17 = vmax.f32 %v1182_v12, 0.0  ;;  %v1185_v18 = vadd.f32 %v3262_v50, %v1184_v16 }
 0x1dd   : > { %v1271_v19 = vmax.f32 %v1193_v15, 0.0 }
 0x1de   : > { %v1269_v20 = vmax.f32 %v1185_v18, 0.0 }
 0x1df   : > { %v1305_v21 = vpack.c.bf16 %v1271_v19, %v1270_v14 }
 0x1e0   : > { %v1304_v22 = vpack.c.bf16 %v1269_v20, %v1268_v17  ;;  %v2446_v23 = vpop.f32.mrb[64].mxu0 }
 0x1e1   : > { %v1206_v24 = vadd.f32 %v2446_v23, %v3262_v50  ;;  %v1197_v25 = vpop.f32.mrb[65].mxu0 }
 0x1e2   : > { %2520 = vmatprep.mubr.bf16.mxu1 %v1304_v22  ;;  %v1198_v26 = vadd.f32 %v3262_v50, %v1197_v25  ;;  %v2447_v27 = vpop.f32.mrb[66].mxu0 }
 0x1e3   : > { %2521 = vmatmul.mubr.bf16.gmra.mrb[60].mxu1 %v1305_v21  ;;  %v1274_v28 = vmax.f32 %v1206_v24, 0.0  ;;  %v1209_v29 = vadd.f32 %v2447_v27, %v3262_v50  ;;  %v1200_v30 = vpop.f32.mrb[67].mxu0 }
 0x1e4   : > { %v1272_v31 = vmax.f32 %v1198_v26, 0.0  ;;  %v1201_v32 = vadd.f32 %v3262_v50, %v1200_v30 }
 0x1e5   : > { %v1275_v33 = vmax.f32 %v1209_v29, 0.0 }
 0x1e6   : > { %v1273_v34 = vmax.f32 %v1201_v32, 0.0 }
 0x1e7   : > { %v1307_v35 = vpack.c.bf16 %v1275_v33, %v1274_v28 }
 0x1e8   : > { %v1306_v36 = vpack.c.bf16 %v1273_v34, %v1272_v31 }
 0x1ea   : > { %2524 = vmatprep.mubr.bf16.mxu1 %v1306_v36 }
 0x1eb   : > { %2525 = vmatmul.mubr.bf16.gmra.mrb[64].mxu1 %v1307_v35 }
 0x1ec   : > { %2564 = vmatprep.mubr.msk.bf16.mxu1 %vm2958_vm0, %v2957_v54 }
 0x226   : > { %v3353_v37 = vpop.f32.mrb[0].mxu1 }
 0x227   : > { %v3355_v38 = vpop.f32.mrb[1].mxu1 }
 0x228   : > { %v3357_v39 = vpop.f32.mrb[2].mxu1 }
 0x229   : > { %v3359_v50 = vpop.f32.mrb[3].mxu1 }
 0x246   : > { %v2466_v40 = vpop.f32.mrb[4].mxu1 }
 0x247   : > { %v1342_v41 = vpop.f32.mrb[5].mxu1  ;;  %v1351_v44 = vadd.f32 %v2466_v40, %v3364_v42 }
 0x248   : > { %v2467_v43 = vpop.f32.mrb[6].mxu1  ;;  %v1343_v47 = vadd.f32 %v3364_v42, %v1342_v41 }
 0x249   : > { %v1354_v45 = vadd.f32 %v2467_v43, %v3364_v42  ;;  %v1345_v46 = vpop.f32.mrb[7].mxu1 }
 0x24a   : > { %v1346_v48 = vadd.f32 %v3364_v42, %v1345_v46 }
 0x24b   : > { %v1602_v49 = vpack.c.bf16 %v1354_v45, %v1351_v44 }
 0x24c   : > { %v1601_v51 = vpack.c.bf16 %v1346_v48, %v1343_v47 }
 0x24e   : > { %v2470_v52 = vpop.f32.mrb[8].mxu1  ;;  %2529 = vmatpush3.bf16.xpose.msra.mxu0 %v1601_v51 }
 0x24f   : > { %v1358_v53 = vpop.f32.mrb[9].mxu1  ;;  %2530 = vmatprep.subr.bf16.mxu0 %v2957_v54  ;;  %v1367_v56 = vadd.f32 %v2470_v52, %v3364_v42 }
 0x250   : > { %v2471_v55 = vpop.f32.mrb[10].mxu1  ;;  %v1359_v59 = vadd.f32 %v3364_v42, %v1358_v53 }
 0x251   : > { %v1370_v57 = vadd.f32 %v2471_v55, %v3364_v42  ;;  %v1361_v58 = vpop.f32.mrb[11].mxu1 }
 0x252   : > { %v1362_v60 = vadd.f32 %v3364_v42, %v1361_v58 }
 0x253   : > { %v1604_v61 = vpack.c.bf16 %v1370_v57, %v1367_v56 }
 0x254   : > { %v1603_v62 = vpack.c.bf16 %v1362_v60, %v1359_v59 }
 0x256   : > { %v2474_v63 = vpop.f32.mrb[12].mxu1  ;;  %2531 = vmatpush3.bf16.xpose.msra.mxu0 %v1602_v49 }
 0x257   : > { %v1374_v0 = vpop.f32.mrb[13].mxu1  ;;  %2532 = vmatprep.subr.bf16.mxu0 %v2957_v54  ;;  %v1383_v2 = vadd.f32 %v2474_v63, %v3364_v42 }
 0x258   : > { %v2475_v1 = vpop.f32.mrb[14].mxu1  ;;  %v1375_v5 = vadd.f32 %v3364_v42, %v1374_v0 }
 0x259   : > { %v1386_v3 = vadd.f32 %v2475_v1, %v3364_v42  ;;  %v1377_v4 = vpop.f32.mrb[15].mxu1 }
 0x25a   : > { %v1378_v6 = vadd.f32 %v3364_v42, %v1377_v4 }
 0x25b   : > { %v1606_v7 = vpack.c.bf16 %v1386_v3, %v1383_v2  ;;  %v653_v2 = vadd.f32 %v3364_v42, %v3355_v38 }
 0x25c   : > { %v1605_v8 = vpack.c.bf16 %v1378_v6, %v1375_v5 }
 0x25e   : > { %v2478_v9 = vpop.f32.mrb[16].mxu1  ;;  %2533 = vmatpush3.bf16.xpose.msra.mxu0 %v1603_v62 }
 0x25f   : > { %v1390_v10 = vpop.f32.mrb[17].mxu1  ;;  %2534 = vmatprep.subr.bf16.mxu0 %v2957_v54  ;;  %v1399_v12 = vadd.f32 %v2478_v9, %v3364_v42 }
 0x260   : > { %v2479_v11 = vpop.f32.mrb[18].mxu1  ;;  %v1391_v15 = vadd.f32 %v3364_v42, %v1390_v10  ;;  %v1597_v10 = vpack.c.bf16 %v653_v2, %v653_v2 }
 0x261   : > { %v1402_v13 = vadd.f32 %v2479_v11, %v3364_v42  ;;  %v1393_v14 = vpop.f32.mrb[19].mxu1 }
 0x262   : > { %v1394_v16 = vadd.f32 %v3364_v42, %v1393_v14 }
 0x263   : > { %v1608_v17 = vpack.c.bf16 %v1402_v13, %v1399_v12 }
 0x264   : > { %v1607_v18 = vpack.c.bf16 %v1394_v16, %v1391_v15 }
 0x266   : > { %v2482_v19 = vpop.f32.mrb[20].mxu1  ;;  %2535 = vmatpush3.bf16.xpose.msra.mxu0 %v1604_v61 }
 0x267   : > { %v1406_v20 = vpop.f32.mrb[21].mxu1  ;;  %2536 = vmatprep.subr.bf16.mxu0 %v2957_v54  ;;  %v1415_v22 = vadd.f32 %v2482_v19, %v3364_v42 }
 0x268   : > { %v2483_v21 = vpop.f32.mrb[22].mxu1  ;;  %v1407_v25 = vadd.f32 %v3364_v42, %v1406_v20 }
 0x269   : > { %v1418_v23 = vadd.f32 %v2483_v21, %v3364_v42  ;;  %v1409_v24 = vpop.f32.mrb[23].mxu1 }
 0x26a   : > { %v1410_v26 = vadd.f32 %v3364_v42, %v1409_v24 }
 0x26b   : > { %v1610_v27 = vpack.c.bf16 %v1418_v23, %v1415_v22 }
 0x26c   : > { %v1609_v28 = vpack.c.bf16 %v1410_v26, %v1407_v25 }
 0x26e   : > { %2537 = vmatpush3.bf16.xpose.msra.mxu0 %v1605_v8  ;;  %2549 = vmatpush3.bf16.xpose.msra.mxu1 %v1609_v28  ;;  %v2486_v29 = vpop.f32.mrb[24].mxu1 }
 0x26f   : > { %2538 = vmatprep.subr.bf16.mxu0 %v2957_v54  ;;  %2550 = vmatprep.subr.bf16.mxu1 %v2957_v54  ;;  %v1422_v30 = vpop.f32.mrb[25].mxu1  ;;  %v1431_v32 = vadd.f32 %v2486_v29, %v3364_v42 }
 0x270   : > { %v2487_v31 = vpop.f32.mrb[26].mxu1  ;;  %v1423_v35 = vadd.f32 %v3364_v42, %v1422_v30 }
 0x271   : > { %v1434_v33 = vadd.f32 %v2487_v31, %v3364_v42  ;;  %v1425_v34 = vpop.f32.mrb[27].mxu1 }
 0x272   : > { %v1426_v36 = vadd.f32 %v3364_v42, %v1425_v34 }
 0x273   : > { %v1612_v40 = vpack.c.bf16 %v1434_v33, %v1431_v32 }
 0x274   : > { %v1611_v41 = vpack.c.bf16 %v1426_v36, %v1423_v35 }
 0x276   : > { %2539 = vmatpush3.bf16.xpose.msra.mxu0 %v1606_v7  ;;  %2551 = vmatpush3.bf16.xpose.msra.mxu1 %v1610_v27  ;;  %v2490_v43 = vpop.f32.mrb[28].mxu1 }
 0x277   : > { %2540 = vmatprep.subr.bf16.mxu0 %v2957_v54  ;;  %2552 = vmatprep.subr.bf16.mxu1 %v2957_v54  ;;  %v1438_v44 = vpop.f32.mrb[29].mxu1  ;;  %v1447_v46 = vadd.f32 %v2490_v43, %v3364_v42 }
 0x278   : > { %v2491_v45 = vpop.f32.mrb[30].mxu1  ;;  %v1439_v49 = vadd.f32 %v3364_v42, %v1438_v44 }
 0x279   : > { %v1450_v47 = vadd.f32 %v2491_v45, %v3364_v42  ;;  %v1441_v48 = vpop.f32.mrb[31].mxu1 }
 0x27a   : > { %v1442_v51 = vadd.f32 %v3364_v42, %v1441_v48 }
 0x27b   : > { %v1614_v52 = vpack.c.bf16 %v1450_v47, %v1447_v46  ;;  %v656_v47 = vadd.f32 %v3364_v42, %v3359_v50 }
 0x27c   : > { %v1613_v53 = vpack.c.bf16 %v1442_v51, %v1439_v49 }
 0x27e   : > { %2541 = vmatpush3.bf16.xpose.msra.mxu0 %v1607_v18  ;;  %2553 = vmatpush3.bf16.xpose.msra.mxu1 %v1611_v41  ;;  %v2494_v55 = vpop.f32.mrb[32].mxu1 }
 0x27f   : > { %v1454_v56 = vpop.f32.mrb[33].mxu1  ;;  %2542 = vmatprep.subr.bf16.mxu0 %v2957_v54  ;;  %2554 = vmatprep.subr.bf16.mxu1 %v2957_v54  ;;  %v3405_v58 = vadd.f32 %v2494_v55, %v3364_v42 }
 0x280   : > { %v2495_v57 = vpop.f32.mrb[34].mxu1  ;;  %v1455_v61 = vadd.f32 %v3364_v42, %v1454_v56 }
 0x281   : > { %v3408_v59 = vadd.f32 %v2495_v57, %v3364_v42  ;;  %v1457_v60 = vpop.f32.mrb[35].mxu1  ;;  %v1598_v57 = vpack.c.bf16 %v656_v47, %v656_v47 }
 0x282   : > { %v1458_v62 = vadd.f32 %v3364_v42, %v1457_v60 }
 0x283   : > { %v1616_v63 = vpack.c.bf16 %v3408_v59, %v3405_v58 }
 0x284   : > { %v1615_v0 = vpack.c.bf16 %v1458_v62, %v1455_v61 }
 0x286   : > { %v2498_v1 = vpop.f32.mrb[36].mxu1  ;;  %2543 = vmatpush3.bf16.xpose.msra.mxu0 %v1608_v17  ;;  %2555 = vmatpush3.bf16.xpose.msra.mxu1 %v1612_v40 }
 0x287   : > { %v1470_v3 = vpop.f32.mrb[37].mxu1  ;;  %2556 = vmatprep.subr.bf16.mxu1 %v2957_v54  ;;  %2568 = vmatprep.subr.bf16.mxu0 %v2957_v54  ;;  %v1479_v5 = vadd.f32 %v2498_v1, %v3364_v42 }
 0x288   : > { %v2499_v4 = vpop.f32.mrb[38].mxu1  ;;  %v1471_v8 = vadd.f32 %v3364_v42, %v1470_v3 }
 0x289   : > { %v1482_v6 = vadd.f32 %v2499_v4, %v3364_v42  ;;  %v1473_v7 = vpop.f32.mrb[39].mxu1 }
 0x28a   : > { %v1474_v9 = vadd.f32 %v3364_v42, %v1473_v7 }
 0x28b   : > { %v1618_v11 = vpack.c.bf16 %v1482_v6, %v1479_v5 }
 0x28c   : > { %v1617_v12 = vpack.c.bf16 %v1474_v9, %v1471_v8 }
 0x28d   : > { %2545 = vmatmul.mubr.bf16.vlgmr.msra.gmra.mrb[68].mxu0 %v1597_v10 }
 0x28e   : > { %2557 = vmatpush3.bf16.xpose.msra.mxu1 %v1613_v53  ;;  %2569 = vmatpush3.bf16.xpose.msra.mxu0 %v1617_v12  ;;  %v2502_v38 = vpop.f32.mrb[40].mxu1 }
 0x28f   : > { %2558 = vmatprep.subr.bf16.mxu1 %v2957_v54  ;;  %2570 = vmatprep.subr.bf16.mxu0 %v2957_v54  ;;  %v1486_v13 = vpop.f32.mrb[41].mxu1  ;;  %v1495_v15 = vadd.f32 %v2502_v38, %v3364_v42 }
 0x290   : > { %v2503_v14 = vpop.f32.mrb[42].mxu1  ;;  %2584 = vmatprep.mubr.msk.bf16.mxu0 %vm2958_vm0, %v2957_v54  ;;  %v1487_v18 = vadd.f32 %v3364_v42, %v1486_v13 }
 0x291   : > { %v1498_v16 = vadd.f32 %v2503_v14, %v3364_v42  ;;  %v1489_v17 = vpop.f32.mrb[43].mxu1 }
 0x292   : > { %v1490_v19 = vadd.f32 %v3364_v42, %v1489_v17 }
 0x293   : > { %v1620_v20 = vpack.c.bf16 %v1498_v16, %v1495_v15 }
 0x294   : > { %v1619_v21 = vpack.c.bf16 %v1490_v19, %v1487_v18 }
 0x296   : > { %2559 = vmatpush3.bf16.xpose.msra.mxu1 %v1614_v52  ;;  %2571 = vmatpush3.bf16.xpose.msra.mxu0 %v1618_v11  ;;  %v2506_v22 = vpop.f32.mrb[44].mxu1 }
 0x297   : > { %2560 = vmatprep.subr.bf16.mxu1 %v2957_v54  ;;  %2572 = vmatprep.subr.bf16.mxu0 %v2957_v54  ;;  %v1502_v23 = vpop.f32.mrb[45].mxu1  ;;  %v1511_v25 = vadd.f32 %v2506_v22, %v3364_v42 }
 0x298   : > { %v2507_v24 = vpop.f32.mrb[46].mxu1  ;;  %v1503_v28 = vadd.f32 %v3364_v42, %v1502_v23 }
 0x299   : > { %v1514_v26 = vadd.f32 %v2507_v24, %v3364_v42  ;;  %v1505_v27 = vpop.f32.mrb[47].mxu1  ;;  %v661_v24 = vadd.f32 %v3353_v37, %v3364_v42 }
 0x29a   : > { %v1506_v29 = vadd.f32 %v3364_v42, %v1505_v27 }
 0x29b   : > { %v1622_v30 = vpack.c.bf16 %v1514_v26, %v1511_v25  ;;  %v1599_v25 = vpack.c.bf16 %v661_v24, %v661_v24  ;;  %v664_v26 = vadd.f32 %v3357_v39, %v3364_v42 }
 0x29c   : > { %v1621_v31 = vpack.c.bf16 %v1506_v29, %v1503_v28  ;;  %v2164_v28 = vld [vmem:[%s3612_s7] ss:$0 sm:$0xff] }
 0x29d   : > { %v1600_v27 = vpack.c.bf16 %v664_v26, %v664_v26 }
 0x29e   : > { %2561 = vmatpush3.bf16.xpose.msra.mxu1 %v1615_v0  ;;  %2573 = vmatpush3.bf16.xpose.msra.mxu0 %v1619_v21  ;;  %v2510_v32 = vpop.f32.mrb[48].mxu1 }
 0x29f   : > { %v1518_v33 = vpop.f32.mrb[49].mxu1  ;;  %2562 = vmatprep.subr.bf16.mxu1 %v2957_v54  ;;  %2574 = vmatprep.subr.bf16.mxu0 %v2957_v54  ;;  %v3439_v35 = vadd.f32 %v2510_v32, %v3364_v42 }
 0x2a0   : > { %v2511_v34 = vpop.f32.mrb[50].mxu1  ;;  %v1519_v41 = vadd.f32 %v3364_v42, %v1518_v33 }
 0x2a1   : > { %v3442_v36 = vadd.f32 %v2511_v34, %v3364_v42  ;;  %v1521_v40 = vpop.f32.mrb[51].mxu1 }
 0x2a2   : > { %v1522_v43 = vadd.f32 %v3364_v42, %v1521_v40 }
 0x2a3   : > { %v1624_v44 = vpack.c.bf16 %v3442_v36, %v3439_v35 }
 0x2a4   : > { %v1623_v45 = vpack.c.bf16 %v1522_v43, %v1519_v41 }
 0x2a6   : > { %v2514_v46 = vpop.f32.mrb[52].mxu1  ;;  %2563 = vmatpush3.bf16.xpose.msra.mxu1 %v1616_v63  ;;  %2575 = vmatpush3.bf16.xpose.msra.mxu0 %v1620_v20 }
 0x2a7   : > { %v1534_v48 = vpop.f32.mrb[53].mxu1  ;;  %2576 = vmatprep.subr.bf16.mxu0 %v2957_v54  ;;  %2588 = vmatprep.subr.bf16.mxu1 %v2957_v54  ;;  %v1543_v51 = vadd.f32 %v2514_v46, %v3364_v42 }
 0x2a8   : > { %v2515_v49 = vpop.f32.mrb[54].mxu1  ;;  %v1535_v55 = vadd.f32 %v3364_v42, %v1534_v48 }
 0x2a9   : > { %v1546_v52 = vadd.f32 %v2515_v49, %v3364_v42  ;;  %v1537_v53 = vpop.f32.mrb[55].mxu1 }
 0x2aa   : > { %v1538_v56 = vadd.f32 %v3364_v42, %v1537_v53 }
 0x2ab   : > { %v1626_v58 = vpack.c.bf16 %v1546_v52, %v1543_v51 }
 0x2ac   : > { %v1625_v59 = vpack.c.bf16 %v1538_v56, %v1535_v55 }
 0x2ad   : > { %2565 = vmatmul.mubr.bf16.vlgmr.msra.gmra.mrb[68].mxu1 %v1598_v57 }
 0x2ae   : > { %2577 = vmatpush3.bf16.xpose.msra.mxu0 %v1621_v31  ;;  %2589 = vmatpush3.bf16.xpose.msra.mxu1 %v1625_v59  ;;  %v2518_v50 = vpop.f32.mrb[56].mxu1  ;;  %v1848_v59 = vld [vmem:[%s3611_s6] sm:$0xff] }
 0x2af   : > { %2578 = vmatprep.subr.bf16.mxu0 %v2957_v54  ;;  %2590 = vmatprep.subr.bf16.mxu1 %v2957_v54  ;;  %v1559_v60 = vadd.f32 %v2518_v50, %v3364_v42  ;;  %v1550_v61 = vpop.f32.mrb[57].mxu1  ;;  %v1849_v50 = vld [vmem:[%s3611_s6 + $0x8] sm:$0xff] }
 0x2b0   : > { %v1551_v62 = vadd.f32 %v3364_v42, %v1550_v61  ;;  %v2519_v63 = vpop.f32.mrb[58].mxu1  ;;  %2604 = vmatprep.mubr.msk.bf16.mxu1 %vm2958_vm0, %v2957_v54 }
 0x2b1   : > { %v1562_v0 = vadd.f32 %v2519_v63, %v3364_v42  ;;  %v1553_v1 = vpop.f32.mrb[59].mxu1 }
 0x2b2   : > { %v1554_v2 = vadd.f32 %v3364_v42, %v1553_v1  ;;  %v1851_v1 = vld [vmem:[%s3611_s6 + $0x18] sm:$0xff] }
 0x2b3   : > { %v1628_v3 = vpack.c.bf16 %v1562_v0, %v1559_v60  ;;  %v2646_v60 = vpack.c.bf16 %v1849_v50, %v1848_v59  ;;  %v1850_v0 = vld [vmem:[%s3611_s6 + $0x10] sm:$0xff] }
 0x2b4   : > { %v1627_v4 = vpack.c.bf16 %v1554_v2, %v1551_v62  ;;  %v1852_v2 = vld [vmem:[%s3611_s6 + $0x20] sm:$0xff] }
 0x2b6   : > { %2579 = vmatpush3.bf16.xpose.msra.mxu0 %v1622_v30  ;;  %2591 = vmatpush3.bf16.xpose.msra.mxu1 %v1626_v58  ;;  %v2522_v5 = vpop.f32.mrb[60].mxu1 }
 0x2b7   : > { %2580 = vmatprep.subr.bf16.mxu0 %v2957_v54  ;;  %2592 = vmatprep.subr.bf16.mxu1 %v2957_v54  ;;  %v1575_v6 = vadd.f32 %v2522_v5, %v3364_v42  ;;  %v1566_v7 = vpop.f32.mrb[61].mxu1 }
 0x2b8   : > { %v1567_v8 = vadd.f32 %v3364_v42, %v1566_v7  ;;  %v2523_v9 = vpop.f32.mrb[62].mxu1  ;;  %v1855_v7 = vld [vmem:[%s3611_s6 + $0x38] sm:$0xff] }
 0x2b9   : > { %v1578_v10 = vadd.f32 %v2523_v9, %v3364_v42  ;;  %v1569_v11 = vpop.f32.mrb[63].mxu1 }
 0x2ba   : > { %v1570_v12 = vadd.f32 %v3364_v42, %v1569_v11  ;;  %v1857_v11 = vld [vmem:[%s3611_s6 + $0x48] sm:$0xff] }
 0x2bb   : > { %v1630_v38 = vpack.c.bf16 %v1578_v10, %v1575_v6  ;;  %v1854_v6 = vld [vmem:[%s3611_s6 + $0x30] sm:$0xff]  ;;  %v1856_v10 = vld [vmem:[%s3611_s6 + $0x40] sm:$0xff] }
 0x2bc   : > { %v1629_v13 = vpack.c.bf16 %v1570_v12, %v1567_v8  ;;  %v2658_v9 = vpack.c.bf16 %v1855_v7, %v1854_v6  ;;  %v2662_v12 = vpack.c.bf16 %v1857_v11, %v1856_v10 }
 0x2be   : > { %2581 = vmatpush3.bf16.xpose.msra.mxu0 %v1623_v45  ;;  %2593 = vmatpush3.bf16.xpose.msra.mxu1 %v1627_v4  ;;  %v2526_v14 = vpop.f32.mrb[64].mxu1  ;;  %v1853_v4 = vld [vmem:[%s3611_s6 + $0x28] sm:$0xff] }
 0x2bf   : > { %2582 = vmatprep.subr.bf16.mxu0 %v2957_v54  ;;  %2594 = vmatprep.subr.bf16.mxu1 %v2957_v54  ;;  %v1591_v15 = vadd.f32 %v2526_v14, %v3364_v42  ;;  %v1582_v16 = vpop.f32.mrb[65].mxu1  ;;  %v2654_v5 = vpack.c.bf16 %v1853_v4, %v1852_v2 }
 0x2c0   : > { %v1583_v17 = vadd.f32 %v3364_v42, %v1582_v16  ;;  %v2527_v18 = vpop.f32.mrb[66].mxu1  ;;  %v1861_v16 = vld [vmem:[%s3611_s6 + $0x68] sm:$0xff] }
 0x2c1   : > { %v1594_v19 = vadd.f32 %v2527_v18, %v3364_v42  ;;  %v1585_v20 = vpop.f32.mrb[67].mxu1 }
 0x2c2   : > { %v1586_v21 = vadd.f32 %v3364_v42, %v1585_v20 }
 0x2c3   : > { %v1632_v22 = vpack.c.bf16 %v1594_v19, %v1591_v15  ;;  %v1860_v15 = vld [vmem:[%s3611_s6 + $0x60] sm:$0xff]  ;;  %v1863_v19 = vld [vmem:[%s3611_s6 + $0x78] sm:$0xff] }
 0x2c4   : > { %v1631_v23 = vpack.c.bf16 %v1586_v21, %v1583_v17  ;;  %v1862_v17 = vld [vmem:[%s3611_s6 + $0x70] sm:$0xff]  ;;  %v2670_v18 = vpack.c.bf16 %v1861_v16, %v1860_v15 }
 0x2c6   : > { %2583 = vmatpush3.bf16.xpose.msra.mxu0 %v1624_v44  ;;  %2595 = vmatpush3.bf16.xpose.msra.mxu1 %v1628_v3  ;;  %v2650_v3 = vpack.c.bf16 %v1851_v1, %v1850_v0 }
 0x2c7   : > { %2596 = vmatprep.subr.bf16.mxu1 %v2957_v54  ;;  %2647 = vmatprep.subr.bf16.mxu0 %v2646_v60 }
 0x2cd   : > { %2585 = vmatmul.mubr.bf16.vlgmr.msra.gmra.mrb[72].mxu0 %v1599_v25 }
 0x2ce   : > { %2597 = vmatpush3.bf16.xpose.msra.mxu1 %v1629_v13  ;;  %2649 = vmatpush3.bf16.msra.mxu0 %v2646_v60  ;;  %v1859_v13 = vld [vmem:[%s3611_s6 + $0x58] sm:$0xff] }
 0x2cf   : > { %2598 = vmatprep.subr.bf16.mxu1 %v2957_v54  ;;  %2651 = vmatprep.subr.bf16.mxu0 %v2650_v3 }
 0x2d2   : > { %2653 = vmatpush3.bf16.msra.mxu0 %v2650_v3 }
 0x2d3   : > { %2655 = vmatprep.subr.bf16.mxu0 %v2654_v5 }
 0x2d6   : > { %2599 = vmatpush3.bf16.xpose.msra.mxu1 %v1630_v38  ;;  %2657 = vmatpush3.bf16.msra.mxu0 %v2654_v5  ;;  %v1858_v38 = vld [vmem:[%s3611_s6 + $0x50] sm:$0xff] }
 0x2d7   : > { %2600 = vmatprep.subr.bf16.mxu1 %v2957_v54  ;;  %2659 = vmatprep.subr.bf16.mxu0 %v2658_v9  ;;  %v2666_v14 = vpack.c.bf16 %v1859_v13, %v1858_v38 }
 0x2da   : > { %2661 = vmatpush3.bf16.msra.mxu0 %v2658_v9 }
 0x2db   : > { %2663 = vmatprep.subr.bf16.mxu0 %v2662_v12 }
 0x2de   : > { %2601 = vmatpush3.bf16.xpose.msra.mxu1 %v1631_v23  ;;  %2665 = vmatpush3.bf16.msra.mxu0 %v2662_v12 }
 0x2df   : > { %2602 = vmatprep.subr.bf16.mxu1 %v2957_v54  ;;  %2667 = vmatprep.subr.bf16.mxu0 %v2666_v14 }
 0x2e2   : > { %2669 = vmatpush3.bf16.msra.mxu0 %v2666_v14 }
 0x2e3   : > { %2671 = vmatprep.subr.bf16.mxu0 %v2670_v18 }
 0x2e6   : > { %2603 = vmatpush3.bf16.xpose.msra.mxu1 %v1632_v22  ;;  %v2674_v22 = vpack.c.bf16 %v1863_v19, %v1862_v17  ;;  %2673 = vmatpush3.bf16.msra.mxu0 %v2670_v18 }
 0x2e7   : > { %2678 = vmatprep.subr.bf16.mxu1 %v2646_v60 }
 0x2e8   : > { %2675 = vmatprep.subr.bf16.mxu0 %v2674_v22 }
 0x2ea   : > { %2677 = vmatpush3.bf16.msra.mxu0 %v2674_v22 }
 0x2ed   : > { %2605 = vmatmul.mubr.bf16.vlgmr.msra.gmra.mrb[72].mxu1 %v1600_v27 }
 0x2ee   : > { %2686 = vmatpush3.bf16.msra.mxu1 %v2646_v60 }
 0x2ef   : > { %2679 = vmatprep.subr.bf16.mxu1 %v2650_v3 }
 0x2f2   : > { %2687 = vmatpush3.bf16.msra.mxu1 %v2650_v3 }
 0x2f3   : > { %2680 = vmatprep.subr.bf16.mxu1 %v2654_v5 }
 0x2f6   : > { %2688 = vmatpush3.bf16.msra.mxu1 %v2654_v5 }
 0x2f7   : > { %2681 = vmatprep.subr.bf16.mxu1 %v2658_v9 }
 0x2fa   : > { %2689 = vmatpush3.bf16.msra.mxu1 %v2658_v9 }
 0x2fb   : > { %2682 = vmatprep.subr.bf16.mxu1 %v2662_v12 }
 0x2fe   : > { %2690 = vmatpush3.bf16.msra.mxu1 %v2662_v12 }
 0x2ff   : > { %2683 = vmatprep.subr.bf16.mxu1 %v2666_v14 }
 0x302   : > { %2691 = vmatpush3.bf16.msra.mxu1 %v2666_v14 }
 0x303   : > { %2684 = vmatprep.subr.bf16.mxu1 %v2670_v18 }
 0x306   : > { %2692 = vmatpush3.bf16.msra.mxu1 %v2670_v18 }
 0x307   : > { %2685 = vmatprep.subr.bf16.mxu1 %v2674_v22 }
 0x30a   : > { %2693 = vmatpush3.bf16.msra.mxu1 %v2674_v22 }
 0x360   : > { %v1667_v37 = vpop.f32.mrb[68].mxu0 }
 0x361   : > { %v1793_v29 = vmul.f32 0.088388346, %v1667_v37  ;;  %v2546_v30 = vpop.f32.mrb[69].mxu0 }
 0x362   : > { %v1670_v31 = vpop.f32.mrb[70].mxu0 }
 0x363   : > { %v2547_v32 = vpop.f32.mrb[71].mxu0  ;;  %v1804_v33 = vadd.f32 %v2164_v28, %v1793_v29 }
 0x365   : > { %1808 = vmax.xlane.f32.xlu0 %v1804_v33 }
 0x380   : > { %v1707_v34 = vpop.f32.mrb[68].mxu1 }
 0x381   : > { %v1794_v35 = vmul.f32 0.088388346, %v1707_v34  ;;  %v2566_v54 = vpop.f32.mrb[69].mxu1 }
 0x382   : > { %v1710_v36 = vpop.f32.mrb[70].mxu1 }
 0x383   : > { %v2567_v40 = vpop.f32.mrb[71].mxu1  ;;  %v1805_v41 = vadd.f32 %v2164_v28, %v1794_v35 }
 0x385   : > { %1810 = vmax.xlane.f32.xlu1 %v1805_v41 }
 0x3a0   : > { %v1747_v39 = vpop.f32.mrb[72].mxu0 }
 0x3a1   : > { %v1795_v42 = vmul.f32 0.088388346, %v1747_v39  ;;  %v2586_v43 = vpop.f32.mrb[73].mxu0 }
 0x3a2   : > { %v1750_v44 = vpop.f32.mrb[74].mxu0 }
 0x3a3   : > { %v2587_v45 = vpop.f32.mrb[75].mxu0  ;;  %v3487_v46 = vadd.f32 %v2164_v28, %v1795_v42 }
 0x3a5   : > { %1812 = vmax.xlane.f32.xlu0 %v3487_v46 }
 0x3c0   : > { %v1787_v47 = vpop.f32.mrb[72].mxu1 }
 0x3c1   : > { %v1796_v48 = vmul.f32 0.088388346, %v1787_v47  ;;  %v2606_v49 = vpop.f32.mrb[73].mxu1 }
 0x3c2   : > { %v1790_v51 = vpop.f32.mrb[74].mxu1 }
 0x3c3   : > { %v2607_v52 = vpop.f32.mrb[75].mxu1  ;;  %v3490_v53 = vadd.f32 %v2164_v28, %v1796_v48 }
 0x3c5   : > { %1814 = vmax.xlane.f32.xlu1 %v3490_v53 }
 0x3f2   : > { %v1809_v55 = vpop.xlane.xlu0 %1808 }
 0x3f3   : > { %v1816_v56 = vsub.f32 %v1804_v33, %v1809_v55 }
 0x3f5   : > { %v1820_v57 = vmul.f32 1.442695, %v1816_v56 }
 0x3f7   : > { %2807 = vpow2.f32 %v1820_v57 }
 0x401   : > { %v3493_v58 = vpop.eup %2807 }
 0x402   : > { %1828 = vadd.xlane.f32.xlu0 %v3493_v58 }
 0x412   : > { %v1811_v61 = vpop.xlane.xlu1 %1810 }
 0x413   : > { %v1817_v62 = vsub.f32 %v1805_v41, %v1811_v61 }
 0x415   : > { %v1822_v63 = vmul.f32 1.442695, %v1817_v62 }
 0x417   : > { %2809 = vpow2.f32 %v1822_v63 }
 0x421   : > { %v3520_v8 = vpop.eup %2809 }
 0x422   : > { %1830 = vadd.xlane.f32.xlu0 %v3520_v8 }
 0x432   : > { %v1813_v20 = vpop.xlane.xlu0 %1812 }
 0x433   : > { %v1818_v21 = vsub.f32 %v3487_v46, %v1813_v20 }
 0x435   : > { %v1824_v23 = vmul.f32 1.442695, %v1818_v21 }
 0x437   : > { %2811 = vpow2.f32 %v1824_v23 }
 0x441   : > { %v2812_v24 = vpop.eup %2811 }
 0x442   : > { %1832 = vadd.xlane.f32.xlu1 %v2812_v24 }
 0x452   : > { %v1815_v25 = vpop.xlane.xlu1 %1814 }
 0x453   : > { %v1819_v26 = vsub.f32 %v3490_v53, %v1815_v25 }
 0x455   : > { %v1826_v27 = vmul.f32 1.442695, %v1819_v26 }
 0x457   : > { %2813 = vpow2.f32 %v1826_v27 }
 0x461   : > { %v2814_v37 = vpop.eup %2813 }
 0x462   : > { %1834 = vadd.xlane.f32.xlu1 %v2814_v37 }
 0x48f   : > { %v1829_v28 = vpop.xlane.xlu0 %1828 }
 0x490   : > { %2815 = vrcp.f32 %v1829_v28 }
 0x49a   : > { %v2816_v29 = vpop.eup %2815 }
 0x49b   : > { %v1840_v30 = vmul.f32 %v2816_v29, %v3493_v58 }
 0x49d   : > { %1844 = vst [vmem:[%s382_s25] sm:$0xff] %v1840_v30  ;;  %2640 = vmatprep.mubr.f32.mxu0 %v1840_v30 }
 0x4af   : > { %v1831_v31 = vpop.xlane.xlu0 %1830 }
 0x4b0   : > { %2817 = vrcp.f32 %v1831_v31 }
 0x4ba   : > { %v2818_v32 = vpop.eup %2817 }
 0x4bb   : > { %v1841_v33 = vmul.f32 %v2818_v32, %v3520_v8 }
 0x4bd   : > { %1845 = vst [vmem:[%s382_s25 + $0x8] sm:$0xff] %v1841_v33  ;;  %2641 = vmatmul.mubr.f32.vlgmr.msra.gmra.mrb[76].mxu0 %v1841_v33 }
 0x4cf   : > { %v1833_v34 = vpop.xlane.xlu1 %1832 }
 0x4d0   : > { %2819 = vrcp.f32 %v1833_v34 }
 0x4da   : > { %v2820_v35 = vpop.eup %2819 }
 0x4db   : > { %v1842_v54 = vmul.f32 %v2820_v35, %v2812_v24 }
 0x4dd   : > { %1846 = vst [vmem:[%s382_s25 + $0x10] sm:$0xff] %v1842_v54  ;;  %2643 = vmatprep.mubr.f32.mxu1 %v1842_v54 }
 0x4ef   : > { %v1835_v36 = vpop.xlane.xlu1 %1834 }
 0x4f0   : > { %2821 = vrcp.f32 %v1835_v36 }
 0x4fa   : > { %v2822_v40 = vpop.eup %2821 }
 0x4fb   : > { %v1843_v41 = vmul.f32 %v2822_v40, %v2814_v37 }
 0x4fd   : > { %1847 = vst [vmem:[%s382_s25 + $0x18] sm:$0xff] %v1843_v41  ;;  %2644 = vmatmul.mubr.f32.vlgmr.msra.gmra.mrb[76].mxu1 %v1843_v41 }
 0x4fe   : > { %2894 = shalt.err (!%p2891_p9)
}
 0x4ff   : > { %s2895_s13 = scalar_lea.hbm %s3558_s15, 512  ;;  %s2899_s22 = scalar_lea.hbm %s3613_s8, 2048 }
 0x500   : > { %p2896_p1 = scmp.ne.s32.totalorder %s3558_s15, %s2895_s13  ;;  %p2900_p10 = scmp.lt.u32.totalorder %s3558_s15, %s3613_s8 }
 0x501   : > { %p2901_p2 = scmp.lt.u32.totalorder %s2899_s22, %s2895_s13  ;;  %p2903_p6 = scmp.lt.u32.totalorder %s2895_s13, %s3558_s15 }
 0x502   : > { %p2897_p0 = pnand %p2896_p1, %p3098_p12 }
 0x503   : > { %p2902_p4 = por %p2901_p2, %p2900_p10 }
 0x504   : > { %p2898_p5 = pneg %p2897_p0 }
 0x505   : > { %p2904_p8 = por %p2903_p6, %p2902_p4 }
 0x507   : > { %p2905_p11 = pnand %p2904_p8, %p2898_p5 }
 0x509   : > { %2908 = shalt.err (!%p2905_p11)
}
 0x50a   : > { %s2960_s18 = smov 128   ;;  %s2961_s24 = smov 8   ;;  %vm1949_vm1 = vcmask 7168  }
 0x50b   : > { %2700 = dma.vmem_to_hbm [thread:$0]  (%p3098_p12), %s3552_s26, 512, %s3558_s15, %s1955_s21, %s2960_s18, %s2960_s18, %s2961_s24  }
 0x50c   : > { %s2111_s19 = sshll.u32 %s3643_s17, 3 }
 0x50d   : > { %s402_s25 = scalar_lea.vmem %s3614_s9, %s2111_s19 }
 0x590   : > { %v2642_v39 = vpop.f32.mrb[76].mxu0 }
 0x591   : > { %1951 = vst.msk [vmem:[%s402_s25 + $0x8] sm:$0xff] %vm1949_vm1, %v2642_v39  ;;  %v1930_v42 = vpop.f32.mrb[77].mxu0 }
 0x592   : > { %1950 = vst.msk [vmem:[%s402_s25] sm:$0xff] %vm1949_vm1, %v1930_v42 }
 0x5d0   : > { %v2645_v43 = vpop.f32.mrb[76].mxu1 }
 0x5d1   : > { %1953 = vst.msk [vmem:[%s402_s25 + $0x18] sm:$0xff] %vm1949_vm1, %v2645_v43  ;;  %v1940_v44 = vpop.f32.mrb[77].mxu1 }
 0x5d2   : > { %1952 = vst.msk [vmem:[%s402_s25 + $0x10] sm:$0xff] %vm1949_vm1, %v1940_v44 }
 0x5d3 PF: > { %s3636_s29 = sld [smem:[#allocation11_spill]]  ;;  %p2717_p13 = scmp.ge.s32.totalorder %s2951_s12, 2 }
 0x5d4   : > { %s1992_s14 = sand.u32 1, %s2939_s30  }
 0x5d5   : > { %s1993_s17 = scalar_lea.sflag [#allocation4], %s1992_s14 }
 0x5d9   : > { %p3637_p12 = scmp.ne.s32.totalorder %s3636_s29, 0 }
 0x5db   : > { %p2711_p3 = pnand %p2717_p13, %p3637_p12 }
 0x5dd   : > { %2934 = dma.done.wait (!%p2711_p3), %s1993_s17, 512  }
 0x5de   : > { %2936 = vsyncadd (!%p2711_p3), %s1993_s17, 4294966784  ;;  %s3638_s12 = sld [smem:[#allocation12_spill]]  ;;  %s3639_s30 = smov %s2943_s10 }
 0x5df   : > { %s3640_s10 = smov %s2947_s11  ;;  %s3641_s11 = smov %s3094_s28 }
 0x5e4   : > { %p24_p7 = scmp.ge.s32.totalorder %s3638_s12, 6  }
 0x5e6   :  { %26 = sbr.rel (!%p24_p7) target bundleno = 6 (0x6), region = 116 }
 0x5ed   :  { %2006 = vsyncpa [#allocation3], 1 }
 0x5ee   :  { %2008 = vsyncpa [#allocation3 + $0x1], 1 }
 0x5ef   :  { %2009 = vsyncpa [#allocation6], 1 }
 0x5f0   :  { %2010 = vsyncpa [#allocation4], 1 }
 0x5f1   :  { %2012 = vsyncpa [#allocation4 + $0x1], 1 }

</bundles_post_ra>
